<compile_context>
chip_gen: v7x
topology: tpu7x:2x2x1
jax: 0.10.0
libtpu: 0.0.40
codegen_flags: <defaults>
</compile_context>

<pallas_src>
import functools
import math

import numpy as np
import jax
import jax.numpy as jnp
from jax import lax
from jax.experimental import pallas as pl
from jax.experimental.pallas import tpu as pltpu

CNN_PAD = 3  # half-width of the widest conv kernel (kernel_size 7)


def _sigmoid(x):
    # exp/div only (always lowerable); saturates correctly in f32 at both tails.
    return 1.0 / (1.0 + jnp.exp(-x))


def _erf_f32(x):
    # XLA's float32 erf: x * P(x^2)/Q(x^2) on x clamped to [-4, 4] (~1 ulp error).
    a = (-2.72614225801306e-10, 2.77068142495902e-08, -2.10102402082508e-06,
         -5.69250639462346e-05, -7.34990630326855e-04, -2.95459980854025e-03,
         -1.60960333262415e-02)
    b = (-1.45660718464996e-05, -2.13374055278905e-04, -1.68282697438203e-03,
         -7.37332916720468e-03, -1.42647390514189e-02)
    x = jnp.clip(x, -4.0, 4.0)
    x2 = x * x
    num = jnp.full_like(x2, a[0])
    for c in a[1:]:
        num = num * x2 + c
    den = jnp.full_like(x2, b[0])
    for c in b[1:]:
        den = den * x2 + c
    return x * num / den


# ----------------------------- fused whole-model kernel -------------------------

def lstm_model_kernel(tok_ref, emb_ref, wcnn_ref, bcnn_ref,
                      wih_ref, whh_ref, bg_ref, h0_ref, c0_ref,
                      wa_ref, w1_ref, b1_ref, w2_ref, b2_ref,
                      o_ref,
                      xpad_ref, xpf_ref, xpb_ref, hf_ref, hb_ref,
                      hstf_ref, cstf_ref, hstb_ref, cstb_ref,
                      *, nlayers, seq_len, emb_dim, hid):
    L, E = seq_len, emb_dim
    Hd = 4 * E                                   # hidden_dim == 2 * hid
    G = 4 * hid                                  # gates per direction
    Bt = tok_ref.shape[1]                        # padded batch (multiple of 8)
    vocab = emb_ref.shape[0]
    f32 = jnp.float32

    # ---- ascii embedding as a one-hot matmul (padding_idx=0 row of the table is 0) ----
    tok = tok_ref[...]                                                    # (L, Bt, 1) int32
    onehot = (tok == lax.broadcasted_iota(jnp.int32, (L, Bt, vocab), 2)).astype(f32)
    x_emb = jnp.dot(onehot.reshape(L * Bt, vocab), emb_ref[...],
                    preferred_element_type=f32)                           # (L*Bt, E)

    # ---- zero-padded, time-major (flattened) buffer feeding the conv taps ----
    xpad_ref[...] = jnp.zeros_like(xpad_ref)
    xpad_ref[CNN_PAD * Bt:(CNN_PAD + L) * Bt, :] = x_emb

    # ---- SeqCNN: identity | conv3 | conv5 | conv7 fused into one matmul per tap offset ----
    x0 = jnp.zeros((L * Bt, Hd), f32)
    for j in range(2 * CNN_PAD + 1):             # tap offset d = j - 3
        xs = xpad_ref[j * Bt:(j + L) * Bt, :]    # (L*Bt, E), static aligned slice
        x0 = x0 + jnp.dot(xs, wcnn_ref[j], preferred_element_type=f32)
    x0 = x0 + bcnn_ref[...]                      # (L*Bt, Hd) == CNN output / LSTM layer-0 input

    # ---- bidirectional multi-layer LSTM (PyTorch gate order i, f, g, o) ----
    def lstm_cell(gates, c_prev):
        i_g = _sigmoid(gates[:, 0 * hid:1 * hid])
        f_g = _sigmoid(gates[:, 1 * hid:2 * hid])
        g_g = jnp.tanh(gates[:, 2 * hid:3 * hid])
        o_g = _sigmoid(gates[:, 3 * hid:4 * hid])
        c_new = f_g * c_prev + i_g * g_g
        h_new = o_g * jnp.tanh(c_new)
        return h_new, c_new

    for layer in range(nlayers):
        idx_f, idx_b = 2 * layer, 2 * layer + 1
        wf, wb = wih_ref[idx_f], wih_ref[idx_b]                           # (Hd, 4*hid)
        if layer == 0:
            xpf = jnp.dot(x0, wf, preferred_element_type=f32)
            xpb = jnp.dot(x0, wb, preferred_element_type=f32)
        else:
            # next-layer input = [h_fwd | h_bwd]; done with split weights (no lane concat)
            hf = hf_ref[...].reshape(L * Bt, hid)
            hb = hb_ref[...].reshape(L * Bt, hid)
            xpf = (jnp.dot(hf, wf[:hid], preferred_element_type=f32)
                   + jnp.dot(hb, wf[hid:], preferred_element_type=f32))
            xpb = (jnp.dot(hf, wb[:hid], preferred_element_type=f32)
                   + jnp.dot(hb, wb[hid:], preferred_element_type=f32))
        xpf_ref[...] = (xpf + bg_ref[idx_f]).reshape(L, Bt, G)
        xpb_ref[...] = (xpb + bg_ref[idx_b]).reshape(L, Bt, G)

        whh_f, whh_b = whh_ref[idx_f], whh_ref[idx_b]                     # (hid, 4*hid)
        hstf_ref[...] = jnp.broadcast_to(h0_ref[idx_f], (Bt, hid))
        cstf_ref[...] = jnp.broadcast_to(c0_ref[idx_f], (Bt, hid))
        hstb_ref[...] = jnp.broadcast_to(h0_ref[idx_b], (Bt, hid))
        cstb_ref[...] = jnp.broadcast_to(c0_ref[idx_b], (Bt, hid))

        # Forward and backward recurrences interleaved in one loop: two independent
        # dependency chains per iteration -> better MXU/VPU overlap.
        @pl.loop(0, L)
        def _(t):
            tb = L - 1 - t
            gf = xpf_ref[t] + jnp.dot(hstf_ref[...], whh_f, preferred_element_type=f32)
            hfn, cfn = lstm_cell(gf, cstf_ref[...])
            hstf_ref[...] = hfn
            cstf_ref[...] = cfn
            hf_ref[t] = hfn

            gb = xpb_ref[tb] + jnp.dot(hstb_ref[...], whh_b, preferred_element_type=f32)
            hbn, cbn = lstm_cell(gb, cstb_ref[...])
            hstb_ref[...] = hbn
            cstb_ref[...] = cbn
            hb_ref[tb] = hbn

    # ---- SeqAttentionSum: Linear(H,1,no bias) -> softmax over sequence -> weighted sum ----
    hf_all = hf_ref[...]                         # (L, Bt, hid)
    hb_all = hb_ref[...]
    wa = wa_ref[...]                             # (Hd, 1)
    s = (jnp.dot(hf_all.reshape(L * Bt, hid), wa[:hid], preferred_element_type=f32)
         + jnp.dot(hb_all.reshape(L * Bt, hid), wa[hid:], preferred_element_type=f32))
    s = s.reshape(L, Bt, 1)                      # keep 3D: softmax reduces the leading dim
    s = s - jnp.max(s, axis=0, keepdims=True)
    e = jnp.exp(s)
    probs = e / jnp.sum(e, axis=0, keepdims=True)          # softmax over L, per batch element
    pooled_f = jnp.sum(probs * hf_all, axis=0)             # (Bt, hid)
    pooled_b = jnp.sum(probs * hb_all, axis=0)             # (Bt, hid)

    # ---- head: Linear(H, 64) -> exact (erf) GELU -> Linear(64, 1) ----
    w1 = w1_ref[...]                             # (Hd, 64)
    z = (jnp.dot(pooled_f, w1[:hid], preferred_element_type=f32)
         + jnp.dot(pooled_b, w1[hid:], preferred_element_type=f32)
         + b1_ref[...])
    z = 0.5 * z * (1.0 + _erf_f32(z * (1.0 / math.sqrt(2.0))))
    o_ref[...] = jnp.dot(z, w2_ref[...], preferred_element_type=f32) + b2_ref[...]


# ----------------------------- wrapper ------------------------------------------

@functools.partial(jax.jit, static_argnames=("nlayers", "hidden_dim"))
def forward(params, aa_x, *, nlayers, hidden_dim):
    B, L = aa_x.shape
    E = hidden_dim // 4
    hid = hidden_dim // 2
    Lp2 = L + 2 * CNN_PAD

    # Pad batch to a multiple of 8 (sublane size) so all in-kernel (L,B,f) <-> (L*B,f)
    # reshapes are tile-aligned; padded rows use token 0 (== embedding padding_idx).
    Bp = ((B + 7) // 8) * 8
    tok = aa_x.astype(jnp.int32)
    if Bp != B:
        tok = jnp.pad(tok, ((0, Bp - B), (0, 0)))
    tok_t = tok.T[:, :, None]                    # time-major tokens (L, Bp, 1)

    weight_names = ("emb", "w_cnn", "b_cnn", "w_ih", "w_hh", "b_g", "h0", "c0",
                    "w_attn", "w1", "b1", "w2", "b2")
    weights = [params[k] for k in weight_names]

    def full_spec(arr):
        n = arr.ndim
        return pl.BlockSpec(arr.shape, lambda i, n=n: (0,) * n)

    in_specs = [full_spec(tok_t)] + [full_spec(w) for w in weights]

    out = pl.pallas_call(
        functools.partial(lstm_model_kernel, nlayers=nlayers,
                          seq_len=L, emb_dim=E, hid=hid),
        out_shape=jax.ShapeDtypeStruct((Bp, 1), jnp.float32),
        grid=(1,),
        in_specs=in_specs,
        out_specs=pl.BlockSpec((Bp, 1), lambda i: (0, 0)),
        scratch_shapes=[
            pltpu.VMEM((Lp2 * Bp, E), jnp.float32),      # zero-padded CNN input (flattened)
            pltpu.VMEM((L, Bp, 4 * hid), jnp.float32),   # fwd gate pre-activations (all t)
            pltpu.VMEM((L, Bp, 4 * hid), jnp.float32),   # bwd gate pre-activations (all t)
            pltpu.VMEM((L, Bp, hid), jnp.float32),       # fwd hidden states (all t)
            pltpu.VMEM((L, Bp, hid), jnp.float32),       # bwd hidden states (all t)
            pltpu.VMEM((Bp, hid), jnp.float32),          # fwd recurrent h
            pltpu.VMEM((Bp, hid), jnp.float32),          # fwd recurrent c
            pltpu.VMEM((Bp, hid), jnp.float32),          # bwd recurrent h
            pltpu.VMEM((Bp, hid), jnp.float32),          # bwd recurrent c
        ],
        compiler_params=pltpu.CompilerParams(
            dimension_semantics=("arbitrary",)),
    )(tok_t, *weights)
    return out[:B, 0]                                    # .squeeze(-1)


# ----------------------------- parameter construction ---------------------------

def build_params(key, *, hidden_dim, nlayers, out_dim=1, vocab=128):
    assert hidden_dim % 4 == 0
    E = hidden_dim // 4
    hid = hidden_dim // 2
    Hd = hidden_dim
    keys = jax.random.split(key, 12 + 6 * nlayers)
    ki = iter(keys)

    def rnd(shape, scale):
        return (scale * jax.random.normal(next(ki), shape)).astype(jnp.float32)

    # ascii_embedding: nn.Embedding(128, E, padding_idx=0)
    emb = rnd((vocab, E), 0.5).at[0].set(0.0)

    # SeqCNN conv weights in PyTorch layout (out, in, k), fused per tap offset.
    c3_w, c3_b = rnd((E, E, 3), 0.2), rnd((E,), 0.1)
    c5_w, c5_b = rnd((E, E, 5), 0.2), rnd((E,), 0.1)
    c7_w, c7_b = rnd((E, E, 7), 0.2), rnd((E,), 0.1)
    w_cnn = np.zeros((2 * CNN_PAD + 1, E, Hd), np.float32)
    w_cnn[CNN_PAD, :, 0:E] = np.eye(E, dtype=np.float32)          # residual pass-through
    c3n, c5n, c7n = np.asarray(c3_w), np.asarray(c5_w), np.asarray(c7_w)
    for j in range(2 * CNN_PAD + 1):
        d = j - CNN_PAD
        if 0 <= d + 1 < 3:
            w_cnn[j, :, E:2 * E] = c3n[:, :, d + 1].T
        if 0 <= d + 2 < 5:
            w_cnn[j, :, 2 * E:3 * E] = c5n[:, :, d + 2].T
        w_cnn[j, :, 3 * E:4 * E] = c7n[:, :, d + 3].T
    b_cnn = np.concatenate([np.zeros((E,), np.float32),
                            np.asarray(c3_b), np.asarray(c5_b), np.asarray(c7_b)])[None, :]

    # SeqLSTM: bidirectional, per-direction hidden = hid; input size is Hd for every layer.
    lim = 1.0 / math.sqrt(hid)
    w_ih, w_hh, b_g = [], [], []
    for _ in range(2 * nlayers):                 # index = 2*layer + direction
        w_ih.append(rnd((Hd, 4 * hid), lim))     # pre-transposed (in, 4*hid), gate order i,f,g,o
        w_hh.append(rnd((hid, 4 * hid), lim))
        b_g.append(rnd((1, 4 * hid), lim))       # b_ih + b_hh combined
    w_ih, w_hh, b_g = jnp.stack(w_ih), jnp.stack(w_hh), jnp.stack(b_g)
    h0 = jnp.zeros((2 * nlayers, 1, hid), jnp.float32)   # SeqLSTM rnn_h0 / rnn_c0 params
    c0 = jnp.zeros((2 * nlayers, 1, hid), jnp.float32)

    # SeqAttentionSum + MLP head
    w_attn = rnd((Hd, 1), 1.0 / math.sqrt(Hd))           # Linear(H, 1, bias=False), transposed
    w1 = rnd((Hd, 64), 1.0 / math.sqrt(Hd))
    b1 = rnd((1, 64), 0.01)
    w2 = rnd((64, out_dim), 0.125)
    b2 = jnp.zeros((1, out_dim), jnp.float32)

    return dict(emb=emb, w_cnn=jnp.asarray(w_cnn), b_cnn=jnp.asarray(b_cnn),
                w_ih=w_ih, w_hh=w_hh, b_g=b_g, h0=h0, c0=c0,
                w_attn=w_attn, w1=w1, b1=b1, w2=w2, b2=b2)


if __name__ == "__main__":
    # Small shapes consistent with the module (module defaults: hidden_dim=256, nlayers=4).
    B, L, HIDDEN, NLAYERS = 2, 8, 32, 2
    key = jax.random.PRNGKey(0)
    pkey, xkey = jax.random.split(key)
    params = build_params(pkey, hidden_dim=HIDDEN, nlayers=NLAYERS)
    aa_x = jax.random.randint(xkey, (B, L), 1, 128, dtype=jnp.int32)  # ASCII amino-acid codes

    y = forward(params, aa_x, nlayers=NLAYERS, hidden_dim=HIDDEN)
    y = jax.block_until_ready(y)
    assert y.shape == (B,)
    assert bool(jnp.all(jnp.isfinite(y)))
    print("KERNEL_OK")
</pallas_src>

<mosaic_0001>
module attributes {stable_mosaic.version = 11 : i64} {
  func.func @lstm_model_kernel(%arg0: i32, %arg1: memref<8x8x1xi32, #tpu.memory_space<vmem>>, %arg2: memref<128x8xf32, #tpu.memory_space<vmem>>, %arg3: memref<7x8x32xf32, #tpu.memory_space<vmem>>, %arg4: memref<1x32xf32, #tpu.memory_space<vmem>>, %arg5: memref<4x32x64xf32, #tpu.memory_space<vmem>>, %arg6: memref<4x16x64xf32, #tpu.memory_space<vmem>>, %arg7: memref<4x1x64xf32, #tpu.memory_space<vmem>>, %arg8: memref<4x1x16xf32, #tpu.memory_space<vmem>>, %arg9: memref<4x1x16xf32, #tpu.memory_space<vmem>>, %arg10: memref<32x1xf32, #tpu.memory_space<vmem>>, %arg11: memref<32x64xf32, #tpu.memory_space<vmem>>, %arg12: memref<1x64xf32, #tpu.memory_space<vmem>>, %arg13: memref<64x1xf32, #tpu.memory_space<vmem>>, %arg14: memref<1x1xf32, #tpu.memory_space<vmem>>, %arg15: memref<8x1xf32, #tpu.memory_space<vmem>>, %arg16: memref<112x8xf32, #tpu.memory_space<vmem>>, %arg17: memref<8x8x64xf32, #tpu.memory_space<vmem>>, %arg18: memref<8x8x64xf32, #tpu.memory_space<vmem>>, %arg19: memref<8x8x16xf32, #tpu.memory_space<vmem>>, %arg20: memref<8x8x16xf32, #tpu.memory_space<vmem>>, %arg21: memref<8x16xf32, #tpu.memory_space<vmem>>, %arg22: memref<8x16xf32, #tpu.memory_space<vmem>>, %arg23: memref<8x16xf32, #tpu.memory_space<vmem>>, %arg24: memref<8x16xf32, #tpu.memory_space<vmem>>) attributes {dimension_semantics = [#tpu.dimension_semantics<arbitrary>], iteration_bounds = array<i64: 1>, scalar_prefetch = 0 : i64, scratch_operands = 9 : i64, tpu.core_type = #tpu.core_type<tc>, window_params = [{pipeline_mode = #tpu.pipeline_mode<synchronous>, transform_indices = @transform_0, window_bounds = array<i64: 8, 8, 1>}, {pipeline_mode = #tpu.pipeline_mode<synchronous>, transform_indices = @transform_1, window_bounds = array<i64: 128, 8>}, {pipeline_mode = #tpu.pipeline_mode<synchronous>, transform_indices = @transform_2, window_bounds = array<i64: 7, 8, 32>}, {pipeline_mode = #tpu.pipeline_mode<synchronous>, transform_indices = @transform_3, window_bounds = array<i64: 1, 32>}, {pipeline_mode = #tpu.pipeline_mode<synchronous>, transform_indices = @transform_4, window_bounds = array<i64: 4, 32, 64>}, {pipeline_mode = #tpu.pipeline_mode<synchronous>, transform_indices = @transform_5, window_bounds = array<i64: 4, 16, 64>}, {pipeline_mode = #tpu.pipeline_mode<synchronous>, transform_indices = @transform_6, window_bounds = array<i64: 4, 1, 64>}, {pipeline_mode = #tpu.pipeline_mode<synchronous>, transform_indices = @transform_7, window_bounds = array<i64: 4, 1, 16>}, {pipeline_mode = #tpu.pipeline_mode<synchronous>, transform_indices = @transform_8, window_bounds = array<i64: 4, 1, 16>}, {pipeline_mode = #tpu.pipeline_mode<synchronous>, transform_indices = @transform_9, window_bounds = array<i64: 32, 1>}, {pipeline_mode = #tpu.pipeline_mode<synchronous>, transform_indices = @transform_10, window_bounds = array<i64: 32, 64>}, {pipeline_mode = #tpu.pipeline_mode<synchronous>, transform_indices = @transform_11, window_bounds = array<i64: 1, 64>}, {pipeline_mode = #tpu.pipeline_mode<synchronous>, transform_indices = @transform_12, window_bounds = array<i64: 64, 1>}, {pipeline_mode = #tpu.pipeline_mode<synchronous>, transform_indices = @transform_13, window_bounds = array<i64: 1, 1>}, {pipeline_mode = #tpu.pipeline_mode<synchronous>, transform_indices = @transform_14, window_bounds = array<i64: 8, 1>}]} {
    %c0 = arith.constant 0 : index
    %c0_0 = arith.constant 0 : index
    %c0_1 = arith.constant 0 : index
    %0 = vector.load %arg1[%c0, %c0_0, %c0_1] : memref<8x8x1xi32, #tpu.memory_space<vmem>>, vector<8x8x1xi32>
    %1 = tpu.iota {dimensions = array<i32: 2>} : vector<8x8x128xi32>
    %2 = vector.broadcast %0 : vector<8x8x1xi32> to vector<8x8x128xi32>
    %3 = arith.cmpi eq, %2, %1 : vector<8x8x128xi32>
    %4 = arith.extui %3 : vector<8x8x128xi1> to vector<8x8x128xi32>
    %5 = arith.sitofp %4 : vector<8x8x128xi32> to vector<8x8x128xf32>
    %6 = vector.shape_cast %5 : vector<8x8x128xf32> to vector<64x128xf32>
    %c0_2 = arith.constant 0 : index
    %c0_3 = arith.constant 0 : index
    %7 = vector.load %arg2[%c0_2, %c0_3] : memref<128x8xf32, #tpu.memory_space<vmem>>, vector<128x8xf32>
    %cst = arith.constant dense<0.000000e+00> : vector<64x8xf32>
    %8 = tpu.matmul %6, %7, %cst {dimension_numbers = #tpu.dot_dimension_numbers<[1], [0], [0], [1], [0, 0, 1, 1], [], []>} : vector<64x128xf32>, vector<128x8xf32>, vector<64x8xf32> -> vector<64x8xf32>
    %cst_4 = arith.constant 0.000000e+00 : f32
    %9 = vector.broadcast %cst_4 : f32 to vector<112x8xf32>
    %c0_5 = arith.constant 0 : index
    %c0_6 = arith.constant 0 : index
    %10 = vector.load %arg16[%c0_5, %c0_6] : memref<112x8xf32, #tpu.memory_space<vmem>>, vector<112x8xf32>
    tpu.vector_store %arg16[%c0_5, %c0_6], %9 {strides = array<i32>} : memref<112x8xf32, #tpu.memory_space<vmem>>, vector<112x8xf32>,
    %c24 = arith.constant 24 : index
    %c0_7 = arith.constant 0 : index
    %11 = vector.load %arg16[%c24, %c0_7] : memref<112x8xf32, #tpu.memory_space<vmem>>, vector<64x8xf32>
    tpu.vector_store %arg16[%c24, %c0_7], %8 {strides = array<i32>} : memref<112x8xf32, #tpu.memory_space<vmem>>, vector<64x8xf32>,
    %cst_8 = arith.constant 0.000000e+00 : f32
    %12 = vector.broadcast %cst_8 : f32 to vector<64x32xf32>
    %c0_9 = arith.constant 0 : index
    %c0_10 = arith.constant 0 : index
    %13 = vector.load %arg16[%c0_9, %c0_10] : memref<112x8xf32, #tpu.memory_space<vmem>>, vector<64x8xf32>
    %c0_11 = arith.constant 0 : index
    %c0_12 = arith.constant 0 : index
    %c0_13 = arith.constant 0 : index
    %14 = vector.load %arg3[%c0_11, %c0_12, %c0_13] : memref<7x8x32xf32, #tpu.memory_space<vmem>>, vector<1x8x32xf32>
    %15 = vector.shape_cast %14 : vector<1x8x32xf32> to vector<8x32xf32>
    %cst_14 = arith.constant dense<0.000000e+00> : vector<64x32xf32>
    %16 = tpu.matmul %13, %15, %cst_14 {dimension_numbers = #tpu.dot_dimension_numbers<[1], [0], [0], [1], [0, 0, 1, 1], [], []>} : vector<64x8xf32>, vector<8x32xf32>, vector<64x32xf32> -> vector<64x32xf32>
    %17 = arith.addf %12, %16 : vector<64x32xf32>
    %c8 = arith.constant 8 : index
    %c0_15 = arith.constant 0 : index
    %18 = vector.load %arg16[%c8, %c0_15] : memref<112x8xf32, #tpu.memory_space<vmem>>, vector<64x8xf32>
    %c1 = arith.constant 1 : index
    %c0_16 = arith.constant 0 : index
    %c0_17 = arith.constant 0 : index
    %19 = vector.load %arg3[%c1, %c0_16, %c0_17] : memref<7x8x32xf32, #tpu.memory_space<vmem>>, vector<1x8x32xf32>
    %20 = vector.shape_cast %19 : vector<1x8x32xf32> to vector<8x32xf32>
    %cst_18 = arith.constant dense<0.000000e+00> : vector<64x32xf32>
    %21 = tpu.matmul %18, %20, %cst_18 {dimension_numbers = #tpu.dot_dimension_numbers<[1], [0], [0], [1], [0, 0, 1, 1], [], []>} : vector<64x8xf32>, vector<8x32xf32>, vector<64x32xf32> -> vector<64x32xf32>
    %22 = arith.addf %17, %21 : vector<64x32xf32>
    %c16 = arith.constant 16 : index
    %c0_19 = arith.constant 0 : index
    %23 = vector.load %arg16[%c16, %c0_19] : memref<112x8xf32, #tpu.memory_space<vmem>>, vector<64x8xf32>
    %c2 = arith.constant 2 : index
    %c0_20 = arith.constant 0 : index
    %c0_21 = arith.constant 0 : index
    %24 = vector.load %arg3[%c2, %c0_20, %c0_21] : memref<7x8x32xf32, #tpu.memory_space<vmem>>, vector<1x8x32xf32>
    %25 = vector.shape_cast %24 : vector<1x8x32xf32> to vector<8x32xf32>
    %cst_22 = arith.constant dense<0.000000e+00> : vector<64x32xf32>
    %26 = tpu.matmul %23, %25, %cst_22 {dimension_numbers = #tpu.dot_dimension_numbers<[1], [0], [0], [1], [0, 0, 1, 1], [], []>} : vector<64x8xf32>, vector<8x32xf32>, vector<64x32xf32> -> vector<64x32xf32>
    %27 = arith.addf %22, %26 : vector<64x32xf32>
    %c24_23 = arith.constant 24 : index
    %c0_24 = arith.constant 0 : index
    %28 = vector.load %arg16[%c24_23, %c0_24] : memref<112x8xf32, #tpu.memory_space<vmem>>, vector<64x8xf32>
    %c3 = arith.constant 3 : index
    %c0_25 = arith.constant 0 : index
    %c0_26 = arith.constant 0 : index
    %29 = vector.load %arg3[%c3, %c0_25, %c0_26] : memref<7x8x32xf32, #tpu.memory_space<vmem>>, vector<1x8x32xf32>
    %30 = vector.shape_cast %29 : vector<1x8x32xf32> to vector<8x32xf32>
    %cst_27 = arith.constant dense<0.000000e+00> : vector<64x32xf32>
    %31 = tpu.matmul %28, %30, %cst_27 {dimension_numbers = #tpu.dot_dimension_numbers<[1], [0], [0], [1], [0, 0, 1, 1], [], []>} : vector<64x8xf32>, vector<8x32xf32>, vector<64x32xf32> -> vector<64x32xf32>
    %32 = arith.addf %27, %31 : vector<64x32xf32>
    %c32 = arith.constant 32 : index
    %c0_28 = arith.constant 0 : index
    %33 = vector.load %arg16[%c32, %c0_28] : memref<112x8xf32, #tpu.memory_space<vmem>>, vector<64x8xf32>
    %c4 = arith.constant 4 : index
    %c0_29 = arith.constant 0 : index
    %c0_30 = arith.constant 0 : index
    %34 = vector.load %arg3[%c4, %c0_29, %c0_30] : memref<7x8x32xf32, #tpu.memory_space<vmem>>, vector<1x8x32xf32>
    %35 = vector.shape_cast %34 : vector<1x8x32xf32> to vector<8x32xf32>
    %cst_31 = arith.constant dense<0.000000e+00> : vector<64x32xf32>
    %36 = tpu.matmul %33, %35, %cst_31 {dimension_numbers = #tpu.dot_dimension_numbers<[1], [0], [0], [1], [0, 0, 1, 1], [], []>} : vector<64x8xf32>, vector<8x32xf32>, vector<64x32xf32> -> vector<64x32xf32>
    %37 = arith.addf %32, %36 : vector<64x32xf32>
    %c40 = arith.constant 40 : index
    %c0_32 = arith.constant 0 : index
    %38 = vector.load %arg16[%c40, %c0_32] : memref<112x8xf32, #tpu.memory_space<vmem>>, vector<64x8xf32>
    %c5 = arith.constant 5 : index
    %c0_33 = arith.constant 0 : index
    %c0_34 = arith.constant 0 : index
    %39 = vector.load %arg3[%c5, %c0_33, %c0_34] : memref<7x8x32xf32, #tpu.memory_space<vmem>>, vector<1x8x32xf32>
    %40 = vector.shape_cast %39 : vector<1x8x32xf32> to vector<8x32xf32>
    %cst_35 = arith.constant dense<0.000000e+00> : vector<64x32xf32>
    %41 = tpu.matmul %38, %40, %cst_35 {dimension_numbers = #tpu.dot_dimension_numbers<[1], [0], [0], [1], [0, 0, 1, 1], [], []>} : vector<64x8xf32>, vector<8x32xf32>, vector<64x32xf32> -> vector<64x32xf32>
    %42 = arith.addf %37, %41 : vector<64x32xf32>
    %c48 = arith.constant 48 : index
    %c0_36 = arith.constant 0 : index
    %43 = vector.load %arg16[%c48, %c0_36] : memref<112x8xf32, #tpu.memory_space<vmem>>, vector<64x8xf32>
    %c6 = arith.constant 6 : index
    %c0_37 = arith.constant 0 : index
    %c0_38 = arith.constant 0 : index
    %44 = vector.load %arg3[%c6, %c0_37, %c0_38] : memref<7x8x32xf32, #tpu.memory_space<vmem>>, vector<1x8x32xf32>
    %45 = vector.shape_cast %44 : vector<1x8x32xf32> to vector<8x32xf32>
    %cst_39 = arith.constant dense<0.000000e+00> : vector<64x32xf32>
    %46 = tpu.matmul %43, %45, %cst_39 {dimension_numbers = #tpu.dot_dimension_numbers<[1], [0], [0], [1], [0, 0, 1, 1], [], []>} : vector<64x8xf32>, vector<8x32xf32>, vector<64x32xf32> -> vector<64x32xf32>
    %47 = arith.addf %42, %46 : vector<64x32xf32>
    %c0_40 = arith.constant 0 : index
    %c0_41 = arith.constant 0 : index
    %48 = vector.load %arg4[%c0_40, %c0_41] : memref<1x32xf32, #tpu.memory_space<vmem>>, vector<1x32xf32>
    %49 = vector.broadcast %48 : vector<1x32xf32> to vector<64x32xf32>
    %50 = arith.addf %47, %49 : vector<64x32xf32>
    %c0_42 = arith.constant 0 : index
    %c0_43 = arith.constant 0 : index
    %c0_44 = arith.constant 0 : index
    %51 = vector.load %arg5[%c0_42, %c0_43, %c0_44] : memref<4x32x64xf32, #tpu.memory_space<vmem>>, vector<1x32x64xf32>
    %52 = vector.shape_cast %51 : vector<1x32x64xf32> to vector<32x64xf32>
    %c1_45 = arith.constant 1 : index
    %c0_46 = arith.constant 0 : index
    %c0_47 = arith.constant 0 : index
    %53 = vector.load %arg5[%c1_45, %c0_46, %c0_47] : memref<4x32x64xf32, #tpu.memory_space<vmem>>, vector<1x32x64xf32>
    %54 = vector.shape_cast %53 : vector<1x32x64xf32> to vector<32x64xf32>
    %cst_48 = arith.constant dense<0.000000e+00> : vector<64x64xf32>
    %55 = tpu.matmul %50, %52, %cst_48 {dimension_numbers = #tpu.dot_dimension_numbers<[1], [0], [0], [1], [0, 0, 1, 1], [], []>} : vector<64x32xf32>, vector<32x64xf32>, vector<64x64xf32> -> vector<64x64xf32>
    %cst_49 = arith.constant dense<0.000000e+00> : vector<64x64xf32>
    %56 = tpu.matmul %50, %54, %cst_49 {dimension_numbers = #tpu.dot_dimension_numbers<[1], [0], [0], [1], [0, 0, 1, 1], [], []>} : vector<64x32xf32>, vector<32x64xf32>, vector<64x64xf32> -> vector<64x64xf32>
    %c0_50 = arith.constant 0 : index
    %c0_51 = arith.constant 0 : index
    %c0_52 = arith.constant 0 : index
    %57 = vector.load %arg7[%c0_50, %c0_51, %c0_52] : memref<4x1x64xf32, #tpu.memory_space<vmem>>, vector<1x1x64xf32>
    %58 = vector.shape_cast %57 : vector<1x1x64xf32> to vector<1x64xf32>
    %59 = vector.broadcast %58 : vector<1x64xf32> to vector<64x64xf32>
    %60 = arith.addf %55, %59 : vector<64x64xf32>
    %61 = vector.shape_cast %60 : vector<64x64xf32> to vector<8x8x64xf32>
    %c0_53 = arith.constant 0 : index
    %c0_54 = arith.constant 0 : index
    %c0_55 = arith.constant 0 : index
    %62 = vector.load %arg17[%c0_53, %c0_54, %c0_55] : memref<8x8x64xf32, #tpu.memory_space<vmem>>, vector<8x8x64xf32>
    tpu.vector_store %arg17[%c0_53, %c0_54, %c0_55], %61 {strides = array<i32>} : memref<8x8x64xf32, #tpu.memory_space<vmem>>, vector<8x8x64xf32>,
    %c1_56 = arith.constant 1 : index
    %c0_57 = arith.constant 0 : index
    %c0_58 = arith.constant 0 : index
    %63 = vector.load %arg7[%c1_56, %c0_57, %c0_58] : memref<4x1x64xf32, #tpu.memory_space<vmem>>, vector<1x1x64xf32>
    %64 = vector.shape_cast %63 : vector<1x1x64xf32> to vector<1x64xf32>
    %65 = vector.broadcast %64 : vector<1x64xf32> to vector<64x64xf32>
    %66 = arith.addf %56, %65 : vector<64x64xf32>
    %67 = vector.shape_cast %66 : vector<64x64xf32> to vector<8x8x64xf32>
    %c0_59 = arith.constant 0 : index
    %c0_60 = arith.constant 0 : index
    %c0_61 = arith.constant 0 : index
    %68 = vector.load %arg18[%c0_59, %c0_60, %c0_61] : memref<8x8x64xf32, #tpu.memory_space<vmem>>, vector<8x8x64xf32>
    tpu.vector_store %arg18[%c0_59, %c0_60, %c0_61], %67 {strides = array<i32>} : memref<8x8x64xf32, #tpu.memory_space<vmem>>, vector<8x8x64xf32>,
    %c0_62 = arith.constant 0 : index
    %c0_63 = arith.constant 0 : index
    %c0_64 = arith.constant 0 : index
    %69 = vector.load %arg6[%c0_62, %c0_63, %c0_64] : memref<4x16x64xf32, #tpu.memory_space<vmem>>, vector<1x16x64xf32>
    %70 = vector.shape_cast %69 : vector<1x16x64xf32> to vector<16x64xf32>
    %c1_65 = arith.constant 1 : index
    %c0_66 = arith.constant 0 : index
    %c0_67 = arith.constant 0 : index
    %71 = vector.load %arg6[%c1_65, %c0_66, %c0_67] : memref<4x16x64xf32, #tpu.memory_space<vmem>>, vector<1x16x64xf32>
    %72 = vector.shape_cast %71 : vector<1x16x64xf32> to vector<16x64xf32>
    %c0_68 = arith.constant 0 : index
    %c0_69 = arith.constant 0 : index
    %c0_70 = arith.constant 0 : index
    %73 = vector.load %arg8[%c0_68, %c0_69, %c0_70] : memref<4x1x16xf32, #tpu.memory_space<vmem>>, vector<1x1x16xf32>
    %74 = vector.shape_cast %73 : vector<1x1x16xf32> to vector<1x16xf32>
    %75 = vector.shape_cast %74 : vector<1x16xf32> to vector<1x16xf32>
    %76 = vector.broadcast %75 : vector<1x16xf32> to vector<8x16xf32>
    %c0_71 = arith.constant 0 : index
    %c0_72 = arith.constant 0 : index
    %77 = vector.load %arg21[%c0_71, %c0_72] : memref<8x16xf32, #tpu.memory_space<vmem>>, vector<8x16xf32>
    tpu.vector_store %arg21[%c0_71, %c0_72], %76 {strides = array<i32>} : memref<8x16xf32, #tpu.memory_space<vmem>>, vector<8x16xf32>,
    %c0_73 = arith.constant 0 : index
    %c0_74 = arith.constant 0 : index
    %c0_75 = arith.constant 0 : index
    %78 = vector.load %arg9[%c0_73, %c0_74, %c0_75] : memref<4x1x16xf32, #tpu.memory_space<vmem>>, vector<1x1x16xf32>
    %79 = vector.shape_cast %78 : vector<1x1x16xf32> to vector<1x16xf32>
    %80 = vector.shape_cast %79 : vector<1x16xf32> to vector<1x16xf32>
    %81 = vector.broadcast %80 : vector<1x16xf32> to vector<8x16xf32>
    %c0_76 = arith.constant 0 : index
    %c0_77 = arith.constant 0 : index
    %82 = vector.load %arg22[%c0_76, %c0_77] : memref<8x16xf32, #tpu.memory_space<vmem>>, vector<8x16xf32>
    tpu.vector_store %arg22[%c0_76, %c0_77], %81 {strides = array<i32>} : memref<8x16xf32, #tpu.memory_space<vmem>>, vector<8x16xf32>,
    %c1_78 = arith.constant 1 : index
    %c0_79 = arith.constant 0 : index
    %c0_80 = arith.constant 0 : index
    %83 = vector.load %arg8[%c1_78, %c0_79, %c0_80] : memref<4x1x16xf32, #tpu.memory_space<vmem>>, vector<1x1x16xf32>
    %84 = vector.shape_cast %83 : vector<1x1x16xf32> to vector<1x16xf32>
    %85 = vector.shape_cast %84 : vector<1x16xf32> to vector<1x16xf32>
    %86 = vector.broadcast %85 : vector<1x16xf32> to vector<8x16xf32>
    %c0_81 = arith.constant 0 : index
    %c0_82 = arith.constant 0 : index
    %87 = vector.load %arg23[%c0_81, %c0_82] : memref<8x16xf32, #tpu.memory_space<vmem>>, vector<8x16xf32>
    tpu.vector_store %arg23[%c0_81, %c0_82], %86 {strides = array<i32>} : memref<8x16xf32, #tpu.memory_space<vmem>>, vector<8x16xf32>,
    %c1_83 = arith.constant 1 : index
    %c0_84 = arith.constant 0 : index
    %c0_85 = arith.constant 0 : index
    %88 = vector.load %arg9[%c1_83, %c0_84, %c0_85] : memref<4x1x16xf32, #tpu.memory_space<vmem>>, vector<1x1x16xf32>
    %89 = vector.shape_cast %88 : vector<1x1x16xf32> to vector<1x16xf32>
    %90 = vector.shape_cast %89 : vector<1x16xf32> to vector<1x16xf32>
    %91 = vector.broadcast %90 : vector<1x16xf32> to vector<8x16xf32>
    %c0_86 = arith.constant 0 : index
    %c0_87 = arith.constant 0 : index
    %92 = vector.load %arg24[%c0_86, %c0_87] : memref<8x16xf32, #tpu.memory_space<vmem>>, vector<8x16xf32>
    tpu.vector_store %arg24[%c0_86, %c0_87], %91 {strides = array<i32>} : memref<8x16xf32, #tpu.memory_space<vmem>>, vector<8x16xf32>,
    %c0_i32 = arith.constant 0 : i32
    %c8_i32 = arith.constant 8 : i32
    %93 = arith.addi %c0_i32, %c8_i32 : i32
    %c1_i32 = arith.constant 1 : i32
    scf.for %arg25 = %c0_i32 to %93 step %c1_i32  : i32 {
      %c1_i32_191 = arith.constant 1 : i32
      %236 = arith.muli %arg25, %c1_i32_191 : i32
      %c0_i32_192 = arith.constant 0 : i32
      %237 = arith.addi %c0_i32_192, %236 : i32
      %c7_i32 = arith.constant 7 : i32
      %238 = arith.subi %c7_i32, %237 : i32
      %239 = arith.index_cast %237 : i32 to index
      %c0_193 = arith.constant 0 : index
      %c0_194 = arith.constant 0 : index
      %240 = vector.load %arg17[%239, %c0_193, %c0_194] : memref<8x8x64xf32, #tpu.memory_space<vmem>>, vector<1x8x64xf32>
      %241 = vector.shape_cast %240 : vector<1x8x64xf32> to vector<8x64xf32>
      %c0_195 = arith.constant 0 : index
      %c0_196 = arith.constant 0 : index
      %242 = vector.load %arg21[%c0_195, %c0_196] : memref<8x16xf32, #tpu.memory_space<vmem>>, vector<8x16xf32>
      %cst_197 = arith.constant dense<0.000000e+00> : vector<8x64xf32>
      %243 = tpu.matmul %242, %70, %cst_197 {dimension_numbers = #tpu.dot_dimension_numbers<[1], [0], [0], [1], [0, 0, 1, 1], [], []>} : vector<8x16xf32>, vector<16x64xf32>, vector<8x64xf32> -> vector<8x64xf32>
      %244 = arith.addf %241, %243 : vector<8x64xf32>
      %c0_198 = arith.constant 0 : index
      %c0_199 = arith.constant 0 : index
      %245 = vector.load %arg22[%c0_198, %c0_199] : memref<8x16xf32, #tpu.memory_space<vmem>>, vector<8x16xf32>
      %246 = vector.extract_strided_slice %244 {offsets = [0, 0], sizes = [8, 16], strides = [1, 1]} : vector<8x64xf32> to vector<8x16xf32>
      %cst_200 = arith.constant 0.000000e+00 : f32
      %247 = vector.broadcast %cst_200 : f32 to vector<8x16xf32>
      %248 = arith.subf %247, %246 : vector<8x16xf32>
      %249 = math.exp %248 : vector<8x16xf32>
      %cst_201 = arith.constant 1.000000e+00 : f32
      %250 = vector.broadcast %cst_201 : f32 to vector<8x16xf32>
      %251 = arith.addf %250, %249 : vector<8x16xf32>
      %cst_202 = arith.constant 1.000000e+00 : f32
      %252 = vector.broadcast %cst_202 : f32 to vector<8x16xf32>
      %253 = arith.divf %252, %251 : vector<8x16xf32>
      %254 = vector.extract_strided_slice %244 {offsets = [0, 16], sizes = [8, 16], strides = [1, 1]} : vector<8x64xf32> to vector<8x16xf32>
      %cst_203 = arith.constant 0.000000e+00 : f32
      %255 = vector.broadcast %cst_203 : f32 to vector<8x16xf32>
      %256 = arith.subf %255, %254 : vector<8x16xf32>
      %257 = math.exp %256 : vector<8x16xf32>
      %cst_204 = arith.constant 1.000000e+00 : f32
      %258 = vector.broadcast %cst_204 : f32 to vector<8x16xf32>
      %259 = arith.addf %258, %257 : vector<8x16xf32>
      %cst_205 = arith.constant 1.000000e+00 : f32
      %260 = vector.broadcast %cst_205 : f32 to vector<8x16xf32>
      %261 = arith.divf %260, %259 : vector<8x16xf32>
      %262 = vector.extract_strided_slice %244 {offsets = [0, 32], sizes = [8, 16], strides = [1, 1]} : vector<8x64xf32> to vector<8x16xf32>
      %263 = math.tanh %262 : vector<8x16xf32>
      %264 = vector.extract_strided_slice %244 {offsets = [0, 48], sizes = [8, 16], strides = [1, 1]} : vector<8x64xf32> to vector<8x16xf32>
      %cst_206 = arith.constant 0.000000e+00 : f32
      %265 = vector.broadcast %cst_206 : f32 to vector<8x16xf32>
      %266 = arith.subf %265, %264 : vector<8x16xf32>
      %267 = math.exp %266 : vector<8x16xf32>
      %cst_207 = arith.constant 1.000000e+00 : f32
      %268 = vector.broadcast %cst_207 : f32 to vector<8x16xf32>
      %269 = arith.addf %268, %267 : vector<8x16xf32>
      %cst_208 = arith.constant 1.000000e+00 : f32
      %270 = vector.broadcast %cst_208 : f32 to vector<8x16xf32>
      %271 = arith.divf %270, %269 : vector<8x16xf32>
      %272 = arith.mulf %261, %245 : vector<8x16xf32>
      %273 = arith.mulf %253, %263 : vector<8x16xf32>
      %274 = arith.addf %272, %273 : vector<8x16xf32>
      %275 = math.tanh %274 : vector<8x16xf32>
      %276 = arith.mulf %271, %275 : vector<8x16xf32>
      %c0_209 = arith.constant 0 : index
      %c0_210 = arith.constant 0 : index
      %277 = vector.load %arg21[%c0_209, %c0_210] : memref<8x16xf32, #tpu.memory_space<vmem>>, vector<8x16xf32>
      tpu.vector_store %arg21[%c0_209, %c0_210], %276 {strides = array<i32>} : memref<8x16xf32, #tpu.memory_space<vmem>>, vector<8x16xf32>,
      %c0_211 = arith.constant 0 : index
      %c0_212 = arith.constant 0 : index
      %278 = vector.load %arg22[%c0_211, %c0_212] : memref<8x16xf32, #tpu.memory_space<vmem>>, vector<8x16xf32>
      tpu.vector_store %arg22[%c0_211, %c0_212], %274 {strides = array<i32>} : memref<8x16xf32, #tpu.memory_space<vmem>>, vector<8x16xf32>,
      %279 = arith.index_cast %237 : i32 to index
      %c0_213 = arith.constant 0 : index
      %c0_214 = arith.constant 0 : index
      %280 = vector.load %arg19[%279, %c0_213, %c0_214] : memref<8x8x16xf32, #tpu.memory_space<vmem>>, vector<1x8x16xf32>
      %281 = vector.shape_cast %280 : vector<1x8x16xf32> to vector<8x16xf32>
      %282 = vector.shape_cast %276 : vector<8x16xf32> to vector<1x8x16xf32>
      tpu.vector_store %arg19[%279, %c0_213, %c0_214], %282 {strides = array<i32>} : memref<8x8x16xf32, #tpu.memory_space<vmem>>, vector<1x8x16xf32>,
      %283 = arith.index_cast %238 : i32 to index
      %c0_215 = arith.constant 0 : index
      %c0_216 = arith.constant 0 : index
      %284 = vector.load %arg18[%283, %c0_215, %c0_216] : memref<8x8x64xf32, #tpu.memory_space<vmem>>, vector<1x8x64xf32>
      %285 = vector.shape_cast %284 : vector<1x8x64xf32> to vector<8x64xf32>
      %c0_217 = arith.constant 0 : index
      %c0_218 = arith.constant 0 : index
      %286 = vector.load %arg23[%c0_217, %c0_218] : memref<8x16xf32, #tpu.memory_space<vmem>>, vector<8x16xf32>
      %cst_219 = arith.constant dense<0.000000e+00> : vector<8x64xf32>
      %287 = tpu.matmul %286, %72, %cst_219 {dimension_numbers = #tpu.dot_dimension_numbers<[1], [0], [0], [1], [0, 0, 1, 1], [], []>} : vector<8x16xf32>, vector<16x64xf32>, vector<8x64xf32> -> vector<8x64xf32>
      %288 = arith.addf %285, %287 : vector<8x64xf32>
      %c0_220 = arith.constant 0 : index
      %c0_221 = arith.constant 0 : index
      %289 = vector.load %arg24[%c0_220, %c0_221] : memref<8x16xf32, #tpu.memory_space<vmem>>, vector<8x16xf32>
      %290 = vector.extract_strided_slice %288 {offsets = [0, 0], sizes = [8, 16], strides = [1, 1]} : vector<8x64xf32> to vector<8x16xf32>
      %cst_222 = arith.constant 0.000000e+00 : f32
      %291 = vector.broadcast %cst_222 : f32 to vector<8x16xf32>
      %292 = arith.subf %291, %290 : vector<8x16xf32>
      %293 = math.exp %292 : vector<8x16xf32>
      %cst_223 = arith.constant 1.000000e+00 : f32
      %294 = vector.broadcast %cst_223 : f32 to vector<8x16xf32>
      %295 = arith.addf %294, %293 : vector<8x16xf32>
      %cst_224 = arith.constant 1.000000e+00 : f32
      %296 = vector.broadcast %cst_224 : f32 to vector<8x16xf32>
      %297 = arith.divf %296, %295 : vector<8x16xf32>
      %298 = vector.extract_strided_slice %288 {offsets = [0, 16], sizes = [8, 16], strides = [1, 1]} : vector<8x64xf32> to vector<8x16xf32>
      %cst_225 = arith.constant 0.000000e+00 : f32
      %299 = vector.broadcast %cst_225 : f32 to vector<8x16xf32>
      %300 = arith.subf %299, %298 : vector<8x16xf32>
      %301 = math.exp %300 : vector<8x16xf32>
      %cst_226 = arith.constant 1.000000e+00 : f32
      %302 = vector.broadcast %cst_226 : f32 to vector<8x16xf32>
      %303 = arith.addf %302, %301 : vector<8x16xf32>
      %cst_227 = arith.constant 1.000000e+00 : f32
      %304 = vector.broadcast %cst_227 : f32 to vector<8x16xf32>
      %305 = arith.divf %304, %303 : vector<8x16xf32>
      %306 = vector.extract_strided_slice %288 {offsets = [0, 32], sizes = [8, 16], strides = [1, 1]} : vector<8x64xf32> to vector<8x16xf32>
      %307 = math.tanh %306 : vector<8x16xf32>
      %308 = vector.extract_strided_slice %288 {offsets = [0, 48], sizes = [8, 16], strides = [1, 1]} : vector<8x64xf32> to vector<8x16xf32>
      %cst_228 = arith.constant 0.000000e+00 : f32
      %309 = vector.broadcast %cst_228 : f32 to vector<8x16xf32>
      %310 = arith.subf %309, %308 : vector<8x16xf32>
      %311 = math.exp %310 : vector<8x16xf32>
      %cst_229 = arith.constant 1.000000e+00 : f32
      %312 = vector.broadcast %cst_229 : f32 to vector<8x16xf32>
      %313 = arith.addf %312, %311 : vector<8x16xf32>
      %cst_230 = arith.constant 1.000000e+00 : f32
      %314 = vector.broadcast %cst_230 : f32 to vector<8x16xf32>
      %315 = arith.divf %314, %313 : vector<8x16xf32>
      %316 = arith.mulf %305, %289 : vector<8x16xf32>
      %317 = arith.mulf %297, %307 : vector<8x16xf32>
      %318 = arith.addf %316, %317 : vector<8x16xf32>
      %319 = math.tanh %318 : vector<8x16xf32>
      %320 = arith.mulf %315, %319 : vector<8x16xf32>
      %c0_231 = arith.constant 0 : index
      %c0_232 = arith.constant 0 : index
      %321 = vector.load %arg23[%c0_231, %c0_232] : memref<8x16xf32, #tpu.memory_space<vmem>>, vector<8x16xf32>
      tpu.vector_store %arg23[%c0_231, %c0_232], %320 {strides = array<i32>} : memref<8x16xf32, #tpu.memory_space<vmem>>, vector<8x16xf32>,
      %c0_233 = arith.constant 0 : index
      %c0_234 = arith.constant 0 : index
      %322 = vector.load %arg24[%c0_233, %c0_234] : memref<8x16xf32, #tpu.memory_space<vmem>>, vector<8x16xf32>
      tpu.vector_store %arg24[%c0_233, %c0_234], %318 {strides = array<i32>} : memref<8x16xf32, #tpu.memory_space<vmem>>, vector<8x16xf32>,
      %323 = arith.index_cast %238 : i32 to index
      %c0_235 = arith.constant 0 : index
      %c0_236 = arith.constant 0 : index
      %324 = vector.load %arg20[%323, %c0_235, %c0_236] : memref<8x8x16xf32, #tpu.memory_space<vmem>>, vector<1x8x16xf32>
      %325 = vector.shape_cast %324 : vector<1x8x16xf32> to vector<8x16xf32>
      %326 = vector.shape_cast %320 : vector<8x16xf32> to vector<1x8x16xf32>
      tpu.vector_store %arg20[%323, %c0_235, %c0_236], %326 {strides = array<i32>} : memref<8x8x16xf32, #tpu.memory_space<vmem>>, vector<1x8x16xf32>,
    }
    %c8_i32_88 = arith.constant 8 : i32
    %c2_89 = arith.constant 2 : index
    %c0_90 = arith.constant 0 : index
    %c0_91 = arith.constant 0 : index
    %94 = vector.load %arg5[%c2_89, %c0_90, %c0_91] : memref<4x32x64xf32, #tpu.memory_space<vmem>>, vector<1x32x64xf32>
    %95 = vector.shape_cast %94 : vector<1x32x64xf32> to vector<32x64xf32>
    %c3_92 = arith.constant 3 : index
    %c0_93 = arith.constant 0 : index
    %c0_94 = arith.constant 0 : index
    %96 = vector.load %arg5[%c3_92, %c0_93, %c0_94] : memref<4x32x64xf32, #tpu.memory_space<vmem>>, vector<1x32x64xf32>
    %97 = vector.shape_cast %96 : vector<1x32x64xf32> to vector<32x64xf32>
    %c0_95 = arith.constant 0 : index
    %c0_96 = arith.constant 0 : index
    %c0_97 = arith.constant 0 : index
    %98 = vector.load %arg19[%c0_95, %c0_96, %c0_97] : memref<8x8x16xf32, #tpu.memory_space<vmem>>, vector<8x8x16xf32>
    %99 = vector.shape_cast %98 : vector<8x8x16xf32> to vector<64x16xf32>
    %c0_98 = arith.constant 0 : index
    %c0_99 = arith.constant 0 : index
    %c0_100 = arith.constant 0 : index
    %100 = vector.load %arg20[%c0_98, %c0_99, %c0_100] : memref<8x8x16xf32, #tpu.memory_space<vmem>>, vector<8x8x16xf32>
    %101 = vector.shape_cast %100 : vector<8x8x16xf32> to vector<64x16xf32>
    %102 = vector.extract_strided_slice %95 {offsets = [0, 0], sizes = [16, 64], strides = [1, 1]} : vector<32x64xf32> to vector<16x64xf32>
    %cst_101 = arith.constant dense<0.000000e+00> : vector<64x64xf32>
    %103 = tpu.matmul %99, %102, %cst_101 {dimension_numbers = #tpu.dot_dimension_numbers<[1], [0], [0], [1], [0, 0, 1, 1], [], []>} : vector<64x16xf32>, vector<16x64xf32>, vector<64x64xf32> -> vector<64x64xf32>
    %104 = vector.extract_strided_slice %95 {offsets = [16, 0], sizes = [16, 64], strides = [1, 1]} : vector<32x64xf32> to vector<16x64xf32>
    %cst_102 = arith.constant dense<0.000000e+00> : vector<64x64xf32>
    %105 = tpu.matmul %101, %104, %cst_102 {dimension_numbers = #tpu.dot_dimension_numbers<[1], [0], [0], [1], [0, 0, 1, 1], [], []>} : vector<64x16xf32>, vector<16x64xf32>, vector<64x64xf32> -> vector<64x64xf32>
    %106 = arith.addf %103, %105 : vector<64x64xf32>
    %107 = vector.extract_strided_slice %97 {offsets = [0, 0], sizes = [16, 64], strides = [1, 1]} : vector<32x64xf32> to vector<16x64xf32>
    %cst_103 = arith.constant dense<0.000000e+00> : vector<64x64xf32>
    %108 = tpu.matmul %99, %107, %cst_103 {dimension_numbers = #tpu.dot_dimension_numbers<[1], [0], [0], [1], [0, 0, 1, 1], [], []>} : vector<64x16xf32>, vector<16x64xf32>, vector<64x64xf32> -> vector<64x64xf32>
    %109 = vector.extract_strided_slice %97 {offsets = [16, 0], sizes = [16, 64], strides = [1, 1]} : vector<32x64xf32> to vector<16x64xf32>
    %cst_104 = arith.constant dense<0.000000e+00> : vector<64x64xf32>
    %110 = tpu.matmul %101, %109, %cst_104 {dimension_numbers = #tpu.dot_dimension_numbers<[1], [0], [0], [1], [0, 0, 1, 1], [], []>} : vector<64x16xf32>, vector<16x64xf32>, vector<64x64xf32> -> vector<64x64xf32>
    %111 = arith.addf %108, %110 : vector<64x64xf32>
    %c2_105 = arith.constant 2 : index
    %c0_106 = arith.constant 0 : index
    %c0_107 = arith.constant 0 : index
    %112 = vector.load %arg7[%c2_105, %c0_106, %c0_107] : memref<4x1x64xf32, #tpu.memory_space<vmem>>, vector<1x1x64xf32>
    %113 = vector.shape_cast %112 : vector<1x1x64xf32> to vector<1x64xf32>
    %114 = vector.broadcast %113 : vector<1x64xf32> to vector<64x64xf32>
    %115 = arith.addf %106, %114 : vector<64x64xf32>
    %116 = vector.shape_cast %115 : vector<64x64xf32> to vector<8x8x64xf32>
    %c0_108 = arith.constant 0 : index
    %c0_109 = arith.constant 0 : index
    %c0_110 = arith.constant 0 : index
    %117 = vector.load %arg17[%c0_108, %c0_109, %c0_110] : memref<8x8x64xf32, #tpu.memory_space<vmem>>, vector<8x8x64xf32>
    tpu.vector_store %arg17[%c0_108, %c0_109, %c0_110], %116 {strides = array<i32>} : memref<8x8x64xf32, #tpu.memory_space<vmem>>, vector<8x8x64xf32>,
    %c3_111 = arith.constant 3 : index
    %c0_112 = arith.constant 0 : index
    %c0_113 = arith.constant 0 : index
    %118 = vector.load %arg7[%c3_111, %c0_112, %c0_113] : memref<4x1x64xf32, #tpu.memory_space<vmem>>, vector<1x1x64xf32>
    %119 = vector.shape_cast %118 : vector<1x1x64xf32> to vector<1x64xf32>
    %120 = vector.broadcast %119 : vector<1x64xf32> to vector<64x64xf32>
    %121 = arith.addf %111, %120 : vector<64x64xf32>
    %122 = vector.shape_cast %121 : vector<64x64xf32> to vector<8x8x64xf32>
    %c0_114 = arith.constant 0 : index
    %c0_115 = arith.constant 0 : index
    %c0_116 = arith.constant 0 : index
    %123 = vector.load %arg18[%c0_114, %c0_115, %c0_116] : memref<8x8x64xf32, #tpu.memory_space<vmem>>, vector<8x8x64xf32>
    tpu.vector_store %arg18[%c0_114, %c0_115, %c0_116], %122 {strides = array<i32>} : memref<8x8x64xf32, #tpu.memory_space<vmem>>, vector<8x8x64xf32>,
    %c2_117 = arith.constant 2 : index
    %c0_118 = arith.constant 0 : index
    %c0_119 = arith.constant 0 : index
    %124 = vector.load %arg6[%c2_117, %c0_118, %c0_119] : memref<4x16x64xf32, #tpu.memory_space<vmem>>, vector<1x16x64xf32>
    %125 = vector.shape_cast %124 : vector<1x16x64xf32> to vector<16x64xf32>
    %c3_120 = arith.constant 3 : index
    %c0_121 = arith.constant 0 : index
    %c0_122 = arith.constant 0 : index
    %126 = vector.load %arg6[%c3_120, %c0_121, %c0_122] : memref<4x16x64xf32, #tpu.memory_space<vmem>>, vector<1x16x64xf32>
    %127 = vector.shape_cast %126 : vector<1x16x64xf32> to vector<16x64xf32>
    %c2_123 = arith.constant 2 : index
    %c0_124 = arith.constant 0 : index
    %c0_125 = arith.constant 0 : index
    %128 = vector.load %arg8[%c2_123, %c0_124, %c0_125] : memref<4x1x16xf32, #tpu.memory_space<vmem>>, vector<1x1x16xf32>
    %129 = vector.shape_cast %128 : vector<1x1x16xf32> to vector<1x16xf32>
    %130 = vector.shape_cast %129 : vector<1x16xf32> to vector<1x16xf32>
    %131 = vector.broadcast %130 : vector<1x16xf32> to vector<8x16xf32>
    %c0_126 = arith.constant 0 : index
    %c0_127 = arith.constant 0 : index
    %132 = vector.load %arg21[%c0_126, %c0_127] : memref<8x16xf32, #tpu.memory_space<vmem>>, vector<8x16xf32>
    tpu.vector_store %arg21[%c0_126, %c0_127], %131 {strides = array<i32>} : memref<8x16xf32, #tpu.memory_space<vmem>>, vector<8x16xf32>,
    %c2_128 = arith.constant 2 : index
    %c0_129 = arith.constant 0 : index
    %c0_130 = arith.constant 0 : index
    %133 = vector.load %arg9[%c2_128, %c0_129, %c0_130] : memref<4x1x16xf32, #tpu.memory_space<vmem>>, vector<1x1x16xf32>
    %134 = vector.shape_cast %133 : vector<1x1x16xf32> to vector<1x16xf32>
    %135 = vector.shape_cast %134 : vector<1x16xf32> to vector<1x16xf32>
    %136 = vector.broadcast %135 : vector<1x16xf32> to vector<8x16xf32>
    %c0_131 = arith.constant 0 : index
    %c0_132 = arith.constant 0 : index
    %137 = vector.load %arg22[%c0_131, %c0_132] : memref<8x16xf32, #tpu.memory_space<vmem>>, vector<8x16xf32>
    tpu.vector_store %arg22[%c0_131, %c0_132], %136 {strides = array<i32>} : memref<8x16xf32, #tpu.memory_space<vmem>>, vector<8x16xf32>,
    %c3_133 = arith.constant 3 : index
    %c0_134 = arith.constant 0 : index
    %c0_135 = arith.constant 0 : index
    %138 = vector.load %arg8[%c3_133, %c0_134, %c0_135] : memref<4x1x16xf32, #tpu.memory_space<vmem>>, vector<1x1x16xf32>
    %139 = vector.shape_cast %138 : vector<1x1x16xf32> to vector<1x16xf32>
    %140 = vector.shape_cast %139 : vector<1x16xf32> to vector<1x16xf32>
    %141 = vector.broadcast %140 : vector<1x16xf32> to vector<8x16xf32>
    %c0_136 = arith.constant 0 : index
    %c0_137 = arith.constant 0 : index
    %142 = vector.load %arg23[%c0_136, %c0_137] : memref<8x16xf32, #tpu.memory_space<vmem>>, vector<8x16xf32>
    tpu.vector_store %arg23[%c0_136, %c0_137], %141 {strides = array<i32>} : memref<8x16xf32, #tpu.memory_space<vmem>>, vector<8x16xf32>,
    %c3_138 = arith.constant 3 : index
    %c0_139 = arith.constant 0 : index
    %c0_140 = arith.constant 0 : index
    %143 = vector.load %arg9[%c3_138, %c0_139, %c0_140] : memref<4x1x16xf32, #tpu.memory_space<vmem>>, vector<1x1x16xf32>
    %144 = vector.shape_cast %143 : vector<1x1x16xf32> to vector<1x16xf32>
    %145 = vector.shape_cast %144 : vector<1x16xf32> to vector<1x16xf32>
    %146 = vector.broadcast %145 : vector<1x16xf32> to vector<8x16xf32>
    %c0_141 = arith.constant 0 : index
    %c0_142 = arith.constant 0 : index
    %147 = vector.load %arg24[%c0_141, %c0_142] : memref<8x16xf32, #tpu.memory_space<vmem>>, vector<8x16xf32>
    tpu.vector_store %arg24[%c0_141, %c0_142], %146 {strides = array<i32>} : memref<8x16xf32, #tpu.memory_space<vmem>>, vector<8x16xf32>,
    %c0_i32_143 = arith.constant 0 : i32
    %c8_i32_144 = arith.constant 8 : i32
    %148 = arith.addi %c0_i32_143, %c8_i32_144 : i32
    %c1_i32_145 = arith.constant 1 : i32
    scf.for %arg25 = %c0_i32_143 to %148 step %c1_i32_145  : i32 {
      %c1_i32_191 = arith.constant 1 : i32
      %236 = arith.muli %arg25, %c1_i32_191 : i32
      %c0_i32_192 = arith.constant 0 : i32
      %237 = arith.addi %c0_i32_192, %236 : i32
      %c7_i32 = arith.constant 7 : i32
      %238 = arith.subi %c7_i32, %237 : i32
      %239 = arith.index_cast %237 : i32 to index
      %c0_193 = arith.constant 0 : index
      %c0_194 = arith.constant 0 : index
      %240 = vector.load %arg17[%239, %c0_193, %c0_194] : memref<8x8x64xf32, #tpu.memory_space<vmem>>, vector<1x8x64xf32>
      %241 = vector.shape_cast %240 : vector<1x8x64xf32> to vector<8x64xf32>
      %c0_195 = arith.constant 0 : index
      %c0_196 = arith.constant 0 : index
      %242 = vector.load %arg21[%c0_195, %c0_196] : memref<8x16xf32, #tpu.memory_space<vmem>>, vector<8x16xf32>
      %cst_197 = arith.constant dense<0.000000e+00> : vector<8x64xf32>
      %243 = tpu.matmul %242, %125, %cst_197 {dimension_numbers = #tpu.dot_dimension_numbers<[1], [0], [0], [1], [0, 0, 1, 1], [], []>} : vector<8x16xf32>, vector<16x64xf32>, vector<8x64xf32> -> vector<8x64xf32>
      %244 = arith.addf %241, %243 : vector<8x64xf32>
      %c0_198 = arith.constant 0 : index
      %c0_199 = arith.constant 0 : index
      %245 = vector.load %arg22[%c0_198, %c0_199] : memref<8x16xf32, #tpu.memory_space<vmem>>, vector<8x16xf32>
      %246 = vector.extract_strided_slice %244 {offsets = [0, 0], sizes = [8, 16], strides = [1, 1]} : vector<8x64xf32> to vector<8x16xf32>
      %cst_200 = arith.constant 0.000000e+00 : f32
      %247 = vector.broadcast %cst_200 : f32 to vector<8x16xf32>
      %248 = arith.subf %247, %246 : vector<8x16xf32>
      %249 = math.exp %248 : vector<8x16xf32>
      %cst_201 = arith.constant 1.000000e+00 : f32
      %250 = vector.broadcast %cst_201 : f32 to vector<8x16xf32>
      %251 = arith.addf %250, %249 : vector<8x16xf32>
      %cst_202 = arith.constant 1.000000e+00 : f32
      %252 = vector.broadcast %cst_202 : f32 to vector<8x16xf32>
      %253 = arith.divf %252, %251 : vector<8x16xf32>
      %254 = vector.extract_strided_slice %244 {offsets = [0, 16], sizes = [8, 16], strides = [1, 1]} : vector<8x64xf32> to vector<8x16xf32>
      %cst_203 = arith.constant 0.000000e+00 : f32
      %255 = vector.broadcast %cst_203 : f32 to vector<8x16xf32>
      %256 = arith.subf %255, %254 : vector<8x16xf32>
      %257 = math.exp %256 : vector<8x16xf32>
      %cst_204 = arith.constant 1.000000e+00 : f32
      %258 = vector.broadcast %cst_204 : f32 to vector<8x16xf32>
      %259 = arith.addf %258, %257 : vector<8x16xf32>
      %cst_205 = arith.constant 1.000000e+00 : f32
      %260 = vector.broadcast %cst_205 : f32 to vector<8x16xf32>
      %261 = arith.divf %260, %259 : vector<8x16xf32>
      %262 = vector.extract_strided_slice %244 {offsets = [0, 32], sizes = [8, 16], strides = [1, 1]} : vector<8x64xf32> to vector<8x16xf32>
      %263 = math.tanh %262 : vector<8x16xf32>
      %264 = vector.extract_strided_slice %244 {offsets = [0, 48], sizes = [8, 16], strides = [1, 1]} : vector<8x64xf32> to vector<8x16xf32>
      %cst_206 = arith.constant 0.000000e+00 : f32
      %265 = vector.broadcast %cst_206 : f32 to vector<8x16xf32>
      %266 = arith.subf %265, %264 : vector<8x16xf32>
      %267 = math.exp %266 : vector<8x16xf32>
      %cst_207 = arith.constant 1.000000e+00 : f32
      %268 = vector.broadcast %cst_207 : f32 to vector<8x16xf32>
      %269 = arith.addf %268, %267 : vector<8x16xf32>
      %cst_208 = arith.constant 1.000000e+00 : f32
      %270 = vector.broadcast %cst_208 : f32 to vector<8x16xf32>
      %271 = arith.divf %270, %269 : vector<8x16xf32>
      %272 = arith.mulf %261, %245 : vector<8x16xf32>
      %273 = arith.mulf %253, %263 : vector<8x16xf32>
      %274 = arith.addf %272, %273 : vector<8x16xf32>
      %275 = math.tanh %274 : vector<8x16xf32>
      %276 = arith.mulf %271, %275 : vector<8x16xf32>
      %c0_209 = arith.constant 0 : index
      %c0_210 = arith.constant 0 : index
      %277 = vector.load %arg21[%c0_209, %c0_210] : memref<8x16xf32, #tpu.memory_space<vmem>>, vector<8x16xf32>
      tpu.vector_store %arg21[%c0_209, %c0_210], %276 {strides = array<i32>} : memref<8x16xf32, #tpu.memory_space<vmem>>, vector<8x16xf32>,
      %c0_211 = arith.constant 0 : index
      %c0_212 = arith.constant 0 : index
      %278 = vector.load %arg22[%c0_211, %c0_212] : memref<8x16xf32, #tpu.memory_space<vmem>>, vector<8x16xf32>
      tpu.vector_store %arg22[%c0_211, %c0_212], %274 {strides = array<i32>} : memref<8x16xf32, #tpu.memory_space<vmem>>, vector<8x16xf32>,
      %279 = arith.index_cast %237 : i32 to index
      %c0_213 = arith.constant 0 : index
      %c0_214 = arith.constant 0 : index
      %280 = vector.load %arg19[%279, %c0_213, %c0_214] : memref<8x8x16xf32, #tpu.memory_space<vmem>>, vector<1x8x16xf32>
      %281 = vector.shape_cast %280 : vector<1x8x16xf32> to vector<8x16xf32>
      %282 = vector.shape_cast %276 : vector<8x16xf32> to vector<1x8x16xf32>
      tpu.vector_store %arg19[%279, %c0_213, %c0_214], %282 {strides = array<i32>} : memref<8x8x16xf32, #tpu.memory_space<vmem>>, vector<1x8x16xf32>,
      %283 = arith.index_cast %238 : i32 to index
      %c0_215 = arith.constant 0 : index
      %c0_216 = arith.constant 0 : index
      %284 = vector.load %arg18[%283, %c0_215, %c0_216] : memref<8x8x64xf32, #tpu.memory_space<vmem>>, vector<1x8x64xf32>
      %285 = vector.shape_cast %284 : vector<1x8x64xf32> to vector<8x64xf32>
      %c0_217 = arith.constant 0 : index
      %c0_218 = arith.constant 0 : index
      %286 = vector.load %arg23[%c0_217, %c0_218] : memref<8x16xf32, #tpu.memory_space<vmem>>, vector<8x16xf32>
      %cst_219 = arith.constant dense<0.000000e+00> : vector<8x64xf32>
      %287 = tpu.matmul %286, %127, %cst_219 {dimension_numbers = #tpu.dot_dimension_numbers<[1], [0], [0], [1], [0, 0, 1, 1], [], []>} : vector<8x16xf32>, vector<16x64xf32>, vector<8x64xf32> -> vector<8x64xf32>
      %288 = arith.addf %285, %287 : vector<8x64xf32>
      %c0_220 = arith.constant 0 : index
      %c0_221 = arith.constant 0 : index
      %289 = vector.load %arg24[%c0_220, %c0_221] : memref<8x16xf32, #tpu.memory_space<vmem>>, vector<8x16xf32>
      %290 = vector.extract_strided_slice %288 {offsets = [0, 0], sizes = [8, 16], strides = [1, 1]} : vector<8x64xf32> to vector<8x16xf32>
      %cst_222 = arith.constant 0.000000e+00 : f32
      %291 = vector.broadcast %cst_222 : f32 to vector<8x16xf32>
      %292 = arith.subf %291, %290 : vector<8x16xf32>
      %293 = math.exp %292 : vector<8x16xf32>
      %cst_223 = arith.constant 1.000000e+00 : f32
      %294 = vector.broadcast %cst_223 : f32 to vector<8x16xf32>
      %295 = arith.addf %294, %293 : vector<8x16xf32>
      %cst_224 = arith.constant 1.000000e+00 : f32
      %296 = vector.broadcast %cst_224 : f32 to vector<8x16xf32>
      %297 = arith.divf %296, %295 : vector<8x16xf32>
      %298 = vector.extract_strided_slice %288 {offsets = [0, 16], sizes = [8, 16], strides = [1, 1]} : vector<8x64xf32> to vector<8x16xf32>
      %cst_225 = arith.constant 0.000000e+00 : f32
      %299 = vector.broadcast %cst_225 : f32 to vector<8x16xf32>
      %300 = arith.subf %299, %298 : vector<8x16xf32>
      %301 = math.exp %300 : vector<8x16xf32>
      %cst_226 = arith.constant 1.000000e+00 : f32
      %302 = vector.broadcast %cst_226 : f32 to vector<8x16xf32>
      %303 = arith.addf %302, %301 : vector<8x16xf32>
      %cst_227 = arith.constant 1.000000e+00 : f32
      %304 = vector.broadcast %cst_227 : f32 to vector<8x16xf32>
      %305 = arith.divf %304, %303 : vector<8x16xf32>
      %306 = vector.extract_strided_slice %288 {offsets = [0, 32], sizes = [8, 16], strides = [1, 1]} : vector<8x64xf32> to vector<8x16xf32>
      %307 = math.tanh %306 : vector<8x16xf32>
      %308 = vector.extract_strided_slice %288 {offsets = [0, 48], sizes = [8, 16], strides = [1, 1]} : vector<8x64xf32> to vector<8x16xf32>
      %cst_228 = arith.constant 0.000000e+00 : f32
      %309 = vector.broadcast %cst_228 : f32 to vector<8x16xf32>
      %310 = arith.subf %309, %308 : vector<8x16xf32>
      %311 = math.exp %310 : vector<8x16xf32>
      %cst_229 = arith.constant 1.000000e+00 : f32
      %312 = vector.broadcast %cst_229 : f32 to vector<8x16xf32>
      %313 = arith.addf %312, %311 : vector<8x16xf32>
      %cst_230 = arith.constant 1.000000e+00 : f32
      %314 = vector.broadcast %cst_230 : f32 to vector<8x16xf32>
      %315 = arith.divf %314, %313 : vector<8x16xf32>
      %316 = arith.mulf %305, %289 : vector<8x16xf32>
      %317 = arith.mulf %297, %307 : vector<8x16xf32>
      %318 = arith.addf %316, %317 : vector<8x16xf32>
      %319 = math.tanh %318 : vector<8x16xf32>
      %320 = arith.mulf %315, %319 : vector<8x16xf32>
      %c0_231 = arith.constant 0 : index
      %c0_232 = arith.constant 0 : index
      %321 = vector.load %arg23[%c0_231, %c0_232] : memref<8x16xf32, #tpu.memory_space<vmem>>, vector<8x16xf32>
      tpu.vector_store %arg23[%c0_231, %c0_232], %320 {strides = array<i32>} : memref<8x16xf32, #tpu.memory_space<vmem>>, vector<8x16xf32>,
      %c0_233 = arith.constant 0 : index
      %c0_234 = arith.constant 0 : index
      %322 = vector.load %arg24[%c0_233, %c0_234] : memref<8x16xf32, #tpu.memory_space<vmem>>, vector<8x16xf32>
      tpu.vector_store %arg24[%c0_233, %c0_234], %318 {strides = array<i32>} : memref<8x16xf32, #tpu.memory_space<vmem>>, vector<8x16xf32>,
      %323 = arith.index_cast %238 : i32 to index
      %c0_235 = arith.constant 0 : index
      %c0_236 = arith.constant 0 : index
      %324 = vector.load %arg20[%323, %c0_235, %c0_236] : memref<8x8x16xf32, #tpu.memory_space<vmem>>, vector<1x8x16xf32>
      %325 = vector.shape_cast %324 : vector<1x8x16xf32> to vector<8x16xf32>
      %326 = vector.shape_cast %320 : vector<8x16xf32> to vector<1x8x16xf32>
      tpu.vector_store %arg20[%323, %c0_235, %c0_236], %326 {strides = array<i32>} : memref<8x8x16xf32, #tpu.memory_space<vmem>>, vector<1x8x16xf32>,
    }
    %c8_i32_146 = arith.constant 8 : i32
    %c0_147 = arith.constant 0 : index
    %c0_148 = arith.constant 0 : index
    %c0_149 = arith.constant 0 : index
    %149 = vector.load %arg19[%c0_147, %c0_148, %c0_149] : memref<8x8x16xf32, #tpu.memory_space<vmem>>, vector<8x8x16xf32>
    %c0_150 = arith.constant 0 : index
    %c0_151 = arith.constant 0 : index
    %c0_152 = arith.constant 0 : index
    %150 = vector.load %arg20[%c0_150, %c0_151, %c0_152] : memref<8x8x16xf32, #tpu.memory_space<vmem>>, vector<8x8x16xf32>
    %c0_153 = arith.constant 0 : index
    %c0_154 = arith.constant 0 : index
    %151 = vector.load %arg10[%c0_153, %c0_154] : memref<32x1xf32, #tpu.memory_space<vmem>>, vector<32x1xf32>
    %152 = vector.shape_cast %149 : vector<8x8x16xf32> to vector<64x16xf32>
    %153 = vector.extract_strided_slice %151 {offsets = [0, 0], sizes = [16, 1], strides = [1, 1]} : vector<32x1xf32> to vector<16x1xf32>
    %cst_155 = arith.constant dense<0.000000e+00> : vector<64x1xf32>
    %154 = tpu.matmul %152, %153, %cst_155 {dimension_numbers = #tpu.dot_dimension_numbers<[1], [0], [0], [1], [0, 0, 1, 1], [], []>} : vector<64x16xf32>, vector<16x1xf32>, vector<64x1xf32> -> vector<64x1xf32>
    %155 = vector.shape_cast %150 : vector<8x8x16xf32> to vector<64x16xf32>
    %156 = vector.extract_strided_slice %151 {offsets = [16, 0], sizes = [16, 1], strides = [1, 1]} : vector<32x1xf32> to vector<16x1xf32>
    %cst_156 = arith.constant dense<0.000000e+00> : vector<64x1xf32>
    %157 = tpu.matmul %155, %156, %cst_156 {dimension_numbers = #tpu.dot_dimension_numbers<[1], [0], [0], [1], [0, 0, 1, 1], [], []>} : vector<64x16xf32>, vector<16x1xf32>, vector<64x1xf32> -> vector<64x1xf32>
    %158 = arith.addf %154, %157 : vector<64x1xf32>
    %159 = vector.shape_cast %158 : vector<64x1xf32> to vector<8x8x1xf32>
    %cst_157 = arith.constant dense<0xFF800000> : vector<8x1xf32>
    %160 = vector.multi_reduction <maximumf>, %159, %cst_157 [0] : vector<8x8x1xf32> to vector<8x1xf32>
    %161 = vector.shape_cast %160 : vector<8x1xf32> to vector<1x8x1xf32>
    %162 = vector.broadcast %161 : vector<1x8x1xf32> to vector<8x8x1xf32>
    %163 = arith.subf %159, %162 : vector<8x8x1xf32>
    %164 = math.exp %163 : vector<8x8x1xf32>
    %cst_158 = arith.constant dense<0.000000e+00> : vector<8x1xf32>
    %165 = vector.multi_reduction <add>, %164, %cst_158 [0] : vector<8x8x1xf32> to vector<8x1xf32>
    %166 = vector.shape_cast %165 : vector<8x1xf32> to vector<1x8x1xf32>
    %167 = vector.broadcast %166 : vector<1x8x1xf32> to vector<8x8x1xf32>
    %168 = arith.divf %164, %167 : vector<8x8x1xf32>
    %169 = vector.broadcast %168 : vector<8x8x1xf32> to vector<8x8x16xf32>
    %170 = arith.mulf %169, %149 : vector<8x8x16xf32>
    %cst_159 = arith.constant dense<0.000000e+00> : vector<8x16xf32>
    %171 = vector.multi_reduction <add>, %170, %cst_159 [0] : vector<8x8x16xf32> to vector<8x16xf32>
    %172 = vector.broadcast %168 : vector<8x8x1xf32> to vector<8x8x16xf32>
    %173 = arith.mulf %172, %150 : vector<8x8x16xf32>
    %cst_160 = arith.constant dense<0.000000e+00> : vector<8x16xf32>
    %174 = vector.multi_reduction <add>, %173, %cst_160 [0] : vector<8x8x16xf32> to vector<8x16xf32>
    %c0_161 = arith.constant 0 : index
    %c0_162 = arith.constant 0 : index
    %175 = vector.load %arg11[%c0_161, %c0_162] : memref<32x64xf32, #tpu.memory_space<vmem>>, vector<32x64xf32>
    %176 = vector.extract_strided_slice %175 {offsets = [0, 0], sizes = [16, 64], strides = [1, 1]} : vector<32x64xf32> to vector<16x64xf32>
    %cst_163 = arith.constant dense<0.000000e+00> : vector<8x64xf32>
    %177 = tpu.matmul %171, %176, %cst_163 {dimension_numbers = #tpu.dot_dimension_numbers<[1], [0], [0], [1], [0, 0, 1, 1], [], []>} : vector<8x16xf32>, vector<16x64xf32>, vector<8x64xf32> -> vector<8x64xf32>
    %178 = vector.extract_strided_slice %175 {offsets = [16, 0], sizes = [16, 64], strides = [1, 1]} : vector<32x64xf32> to vector<16x64xf32>
    %cst_164 = arith.constant dense<0.000000e+00> : vector<8x64xf32>
    %179 = tpu.matmul %174, %178, %cst_164 {dimension_numbers = #tpu.dot_dimension_numbers<[1], [0], [0], [1], [0, 0, 1, 1], [], []>} : vector<8x16xf32>, vector<16x64xf32>, vector<8x64xf32> -> vector<8x64xf32>
    %180 = arith.addf %177, %179 : vector<8x64xf32>
    %c0_165 = arith.constant 0 : index
    %c0_166 = arith.constant 0 : index
    %181 = vector.load %arg12[%c0_165, %c0_166] : memref<1x64xf32, #tpu.memory_space<vmem>>, vector<1x64xf32>
    %182 = vector.broadcast %181 : vector<1x64xf32> to vector<8x64xf32>
    %183 = arith.addf %180, %182 : vector<8x64xf32>
    %cst_167 = arith.constant 5.000000e-01 : f32
    %184 = vector.broadcast %cst_167 : f32 to vector<8x64xf32>
    %185 = arith.mulf %184, %183 : vector<8x64xf32>
    %cst_168 = arith.constant 0.707106769 : f32
    %186 = vector.broadcast %cst_168 : f32 to vector<8x64xf32>
    %187 = arith.mulf %183, %186 : vector<8x64xf32>
    %cst_169 = arith.constant -4.000000e+00 : f32
    %cst_170 = arith.constant 4.000000e+00 : f32
    %188 = vector.broadcast %cst_169 : f32 to vector<8x64xf32>
    %189 = arith.maximumf %188, %187 : vector<8x64xf32>
    %190 = vector.broadcast %cst_170 : f32 to vector<8x64xf32>
    %191 = arith.minimumf %190, %189 : vector<8x64xf32>
    %192 = arith.mulf %191, %191 : vector<8x64xf32>
    %cst_171 = arith.constant -2.72614237E-10 : f32
    %193 = vector.broadcast %cst_171 : f32 to vector<8x64xf32>
    %194 = arith.mulf %193, %192 : vector<8x64xf32>
    %cst_172 = arith.constant 2.77068146E-8 : f32
    %195 = vector.broadcast %cst_172 : f32 to vector<8x64xf32>
    %196 = arith.addf %194, %195 : vector<8x64xf32>
    %197 = arith.mulf %196, %192 : vector<8x64xf32>
    %cst_173 = arith.constant -2.10102394E-6 : f32
    %198 = vector.broadcast %cst_173 : f32 to vector<8x64xf32>
    %199 = arith.addf %197, %198 : vector<8x64xf32>
    %200 = arith.mulf %199, %192 : vector<8x64xf32>
    %cst_174 = arith.constant -5.69250624E-5 : f32
    %201 = vector.broadcast %cst_174 : f32 to vector<8x64xf32>
    %202 = arith.addf %200, %201 : vector<8x64xf32>
    %203 = arith.mulf %202, %192 : vector<8x64xf32>
    %cst_175 = arith.constant -7.34990637E-4 : f32
    %204 = vector.broadcast %cst_175 : f32 to vector<8x64xf32>
    %205 = arith.addf %203, %204 : vector<8x64xf32>
    %206 = arith.mulf %205, %192 : vector<8x64xf32>
    %cst_176 = arith.constant -2.954600e-03 : f32
    %207 = vector.broadcast %cst_176 : f32 to vector<8x64xf32>
    %208 = arith.addf %206, %207 : vector<8x64xf32>
    %209 = arith.mulf %208, %192 : vector<8x64xf32>
    %cst_177 = arith.constant -0.0160960332 : f32
    %210 = vector.broadcast %cst_177 : f32 to vector<8x64xf32>
    %211 = arith.addf %209, %210 : vector<8x64xf32>
    %cst_178 = arith.constant -1.45660715E-5 : f32
    %212 = vector.broadcast %cst_178 : f32 to vector<8x64xf32>
    %213 = arith.mulf %212, %192 : vector<8x64xf32>
    %cst_179 = arith.constant -2.13374049E-4 : f32
    %214 = vector.broadcast %cst_179 : f32 to vector<8x64xf32>
    %215 = arith.addf %213, %214 : vector<8x64xf32>
    %216 = arith.mulf %215, %192 : vector<8x64xf32>
    %cst_180 = arith.constant -0.00168282702 : f32
    %217 = vector.broadcast %cst_180 : f32 to vector<8x64xf32>
    %218 = arith.addf %216, %217 : vector<8x64xf32>
    %219 = arith.mulf %218, %192 : vector<8x64xf32>
    %cst_181 = arith.constant -0.00737332925 : f32
    %220 = vector.broadcast %cst_181 : f32 to vector<8x64xf32>
    %221 = arith.addf %219, %220 : vector<8x64xf32>
    %222 = arith.mulf %221, %192 : vector<8x64xf32>
    %cst_182 = arith.constant -0.0142647391 : f32
    %223 = vector.broadcast %cst_182 : f32 to vector<8x64xf32>
    %224 = arith.addf %222, %223 : vector<8x64xf32>
    %225 = arith.mulf %191, %211 : vector<8x64xf32>
    %226 = arith.divf %225, %224 : vector<8x64xf32>
    %cst_183 = arith.constant 1.000000e+00 : f32
    %227 = vector.broadcast %cst_183 : f32 to vector<8x64xf32>
    %228 = arith.addf %227, %226 : vector<8x64xf32>
    %229 = arith.mulf %185, %228 : vector<8x64xf32>
    %c0_184 = arith.constant 0 : index
    %c0_185 = arith.constant 0 : index
    %230 = vector.load %arg13[%c0_184, %c0_185] : memref<64x1xf32, #tpu.memory_space<vmem>>, vector<64x1xf32>
    %cst_186 = arith.constant dense<0.000000e+00> : vector<8x1xf32>
    %231 = tpu.matmul %229, %230, %cst_186 {dimension_numbers = #tpu.dot_dimension_numbers<[1], [0], [0], [1], [0, 0, 1, 1], [], []>} : vector<8x64xf32>, vector<64x1xf32>, vector<8x1xf32> -> vector<8x1xf32>
    %c0_187 = arith.constant 0 : index
    %c0_188 = arith.constant 0 : index
    %232 = vector.load %arg14[%c0_187, %c0_188] : memref<1x1xf32, #tpu.memory_space<vmem>>, vector<1x1xf32>
    %233 = vector.broadcast %232 : vector<1x1xf32> to vector<8x1xf32>
    %234 = arith.addf %231, %233 : vector<8x1xf32>
    %c0_189 = arith.constant 0 : index
    %c0_190 = arith.constant 0 : index
    %235 = vector.load %arg15[%c0_189, %c0_190] : memref<8x1xf32, #tpu.memory_space<vmem>>, vector<8x1xf32>
    tpu.vector_store %arg15[%c0_189, %c0_190], %234 {strides = array<i32>} : memref<8x1xf32, #tpu.memory_space<vmem>>, vector<8x1xf32>,
    return
  }
  func.func @transform_0(%arg0: i32) -> (i32, i32, i32) {
    %c0_i32 = arith.constant 0 : i32
    %c0_i32_0 = arith.constant 0 : i32
    %c0_i32_1 = arith.constant 0 : i32
    %c0_i32_2 = arith.constant 0 : i32
    return %c0_i32, %c0_i32_0, %c0_i32_1 : i32, i32, i32
  }
  func.func @transform_1(%arg0: i32) -> (i32, i32) {
    %c0_i32 = arith.constant 0 : i32
    %c0_i32_0 = arith.constant 0 : i32
    %c0_i32_1 = arith.constant 0 : i32
    return %c0_i32, %c0_i32_0 : i32, i32
  }
  func.func @transform_2(%arg0: i32) -> (i32, i32, i32) {
    %c0_i32 = arith.constant 0 : i32
    %c0_i32_0 = arith.constant 0 : i32
    %c0_i32_1 = arith.constant 0 : i32
    %c0_i32_2 = arith.constant 0 : i32
    return %c0_i32, %c0_i32_0, %c0_i32_1 : i32, i32, i32
  }
  func.func @transform_3(%arg0: i32) -> (i32, i32) {
    %c0_i32 = arith.constant 0 : i32
    %c0_i32_0 = arith.constant 0 : i32
    %c0_i32_1 = arith.constant 0 : i32
    return %c0_i32, %c0_i32_0 : i32, i32
  }
  func.func @transform_4(%arg0: i32) -> (i32, i32, i32) {
    %c0_i32 = arith.constant 0 : i32
    %c0_i32_0 = arith.constant 0 : i32
    %c0_i32_1 = arith.constant 0 : i32
    %c0_i32_2 = arith.constant 0 : i32
    return %c0_i32, %c0_i32_0, %c0_i32_1 : i32, i32, i32
  }
  func.func @transform_5(%arg0: i32) -> (i32, i32, i32) {
    %c0_i32 = arith.constant 0 : i32
    %c0_i32_0 = arith.constant 0 : i32
    %c0_i32_1 = arith.constant 0 : i32
    %c0_i32_2 = arith.constant 0 : i32
    return %c0_i32, %c0_i32_0, %c0_i32_1 : i32, i32, i32
  }
  func.func @transform_6(%arg0: i32) -> (i32, i32, i32) {
    %c0_i32 = arith.constant 0 : i32
    %c0_i32_0 = arith.constant 0 : i32
    %c0_i32_1 = arith.constant 0 : i32
    %c0_i32_2 = arith.constant 0 : i32
    return %c0_i32, %c0_i32_0, %c0_i32_1 : i32, i32, i32
  }
  func.func @transform_7(%arg0: i32) -> (i32, i32, i32) {
    %c0_i32 = arith.constant 0 : i32
    %c0_i32_0 = arith.constant 0 : i32
    %c0_i32_1 = arith.constant 0 : i32
    %c0_i32_2 = arith.constant 0 : i32
    return %c0_i32, %c0_i32_0, %c0_i32_1 : i32, i32, i32
  }
  func.func @transform_8(%arg0: i32) -> (i32, i32, i32) {
    %c0_i32 = arith.constant 0 : i32
    %c0_i32_0 = arith.constant 0 : i32
    %c0_i32_1 = arith.constant 0 : i32
    %c0_i32_2 = arith.constant 0 : i32
    return %c0_i32, %c0_i32_0, %c0_i32_1 : i32, i32, i32
  }
  func.func @transform_9(%arg0: i32) -> (i32, i32) {
    %c0_i32 = arith.constant 0 : i32
    %c0_i32_0 = arith.constant 0 : i32
    %c0_i32_1 = arith.constant 0 : i32
    return %c0_i32, %c0_i32_0 : i32, i32
  }
  func.func @transform_10(%arg0: i32) -> (i32, i32) {
    %c0_i32 = arith.constant 0 : i32
    %c0_i32_0 = arith.constant 0 : i32
    %c0_i32_1 = arith.constant 0 : i32
    return %c0_i32, %c0_i32_0 : i32, i32
  }
  func.func @transform_11(%arg0: i32) -> (i32, i32) {
    %c0_i32 = arith.constant 0 : i32
    %c0_i32_0 = arith.constant 0 : i32
    %c0_i32_1 = arith.constant 0 : i32
    return %c0_i32, %c0_i32_0 : i32, i32
  }
  func.func @transform_12(%arg0: i32) -> (i32, i32) {
    %c0_i32 = arith.constant 0 : i32
    %c0_i32_0 = arith.constant 0 : i32
    %c0_i32_1 = arith.constant 0 : i32
    return %c0_i32, %c0_i32_0 : i32, i32
  }
  func.func @transform_13(%arg0: i32) -> (i32, i32) {
    %c0_i32 = arith.constant 0 : i32
    %c0_i32_0 = arith.constant 0 : i32
    %c0_i32_1 = arith.constant 0 : i32
    return %c0_i32, %c0_i32_0 : i32, i32
  }
  func.func @transform_14(%arg0: i32) -> (i32, i32) {
    %c0_i32 = arith.constant 0 : i32
    %c0_i32_0 = arith.constant 0 : i32
    %c0_i32_1 = arith.constant 0 : i32
    return %c0_i32, %c0_i32_0 : i32, i32
  }
}

</mosaic_0001>

<bundles_post_ra>
// kernel: forward.1
= control target key start
LH: loop header
LB: loop body
LE: loop exit
PB: predicated region body
PF: predicated region fallthrough
CT: control target
= control target key end

     0   :  { %v4393_v0 = vmov 0   ;;  %v57_v34 = vlaneseq  ;;  %v4394_v38 = vmov 1.0   ;;  %vm228_vm8 = vcmask 64512   ;;  %s4780_s20 = smov 0   ;;  %s5146_s0 = inlined_call_operand.vmem [shape: s32[8,8,1], index: 0, kind: input, shape index: {}]   ;;  %s5147_s1 = inlined_call_operand.vmem [shape: f32[128,8], index: 1, kind: input, shape index: {}]   ;;  %s5148_s9 = inlined_call_operand.vmem [shape: f32[32,1], index: 9, kind: input, shape index: {}]   ;;  %s5149_s10 = inlined_call_operand.vmem [shape: f32[32,64], index: 10, kind: input, shape index: {}]   ;;  %s5150_s11 = inlined_call_operand.vmem [shape: f32[1,64], index: 11, kind: input, shape index: {}]   ;;  %s5151_s12 = inlined_call_operand.vmem [shape: f32[64,1], index: 12, kind: input, shape index: {}]   ;;  %s5152_s13 = inlined_call_operand.<no memory space> [shape: f32[1,1], index: 13, kind: input, shape index: {}]   ;;  %s5153_s14 = inlined_call_operand.vmem [shape: f32[8,1], index: 14, kind: output, shape index: {}]   ;;  %s5154_s2 = inlined_call_operand.vmem [shape: f32[7,8,32], index: 2, kind: input, shape index: {}]   ;;  %s5155_s4 = inlined_call_operand.vmem [shape: f32[4,32,64], index: 4, kind: input, shape index: {}]   ;;  %s5156_s3 = inlined_call_operand.vmem [shape: f32[1,32], index: 3, kind: input, shape index: {}]   ;;  %s5157_s7 = inlined_call_operand.vmem [shape: f32[4,1,16], index: 7, kind: input, shape index: {}]   ;;  %s5158_s8 = inlined_call_operand.vmem [shape: f32[4,1,16], index: 8, kind: input, shape index: {}]   ;;  %s5159_s5 = inlined_call_operand.vmem [shape: f32[4,16,64], index: 5, kind: input, shape index: {}]   ;;  %s5160_s6 = inlined_call_operand.vmem [shape: f32[4,1,64], index: 6, kind: input, shape index: {}]  }
   0x1   :  { %4322 = vset.pattern.permute.xlu1 %v4393_v0  ;;  %4321 = vset.pattern.permute.xlu0 %v4393_v0  ;;  %v51_v1 = vld [vmem:[%s5146_s0 + $0x10] sm:$0xff]  ;;  %v49_v2 = vld [vmem:[%s5146_s0] sm:$0xff]  ;;  %v19_v3 = vstv %s5152_s13  ;;  %v52_v4 = vld [vmem:[%s5146_s0 + $0x18] sm:$0xff]  ;;  %v4395_v45 = vmov 0.0   ;;  %vm1266_vm9 = vcmask 261120   ;;  %vm1538_vm10 = vcmask 130048  }
   0x2   :  { %66 = vperm.xlu1 %4322, %v51_v1   ;;  %60 = vperm.xlu0 %4321, %v49_v2   ;;  %20 = vst [vmem:[#allocation11] sm:$0x1] %v19_v3  ;;  %v50_v5 = vld [vmem:[%s5146_s0 + $0x8] sm:$0xff]  ;;  %v107_v6 = vld [vmem:[%s5147_s1] sm:$0xff]  ;;  %v109_v8 = vld [vmem:[%s5147_s1 + $0x10] sm:$0xff]  ;;  %v58_v35 = vand.u32 127, %v57_v34 }
   0x3   :  { %v108_v7 = vld [vmem:[%s5147_s1 + $0x8] sm:$0xff]  ;;  %v110_v9 = vld [vmem:[%s5147_s1 + $0x18] sm:$0xff]  ;;  %v111_v12 = vld [vmem:[%s5147_s1 + $0x20] sm:$0xff]  ;;  %233 = vst.msk [vmem:[#allocation2 + $0x20] sm:$0xff] %vm228_vm8, %v4395_v45  ;;  %vm1396_vm11 = vcmask 523264  }
   0x4   :  { %v4108_v10 = vpack.c.bf16 %v108_v7, %v107_v6  ;;  %v4112_v11 = vpack.c.bf16 %v110_v9, %v109_v8  ;;  %v112_v13 = vld [vmem:[%s5147_s1 + $0x28] sm:$0xff]  ;;  %v53_v15 = vld [vmem:[%s5146_s0 + $0x20] sm:$0xff]  ;;  %v113_v17 = vld [vmem:[%s5147_s1 + $0x30] sm:$0xff]  ;;  %229 = vst.msk [vmem:[#allocation2] sm:$0xff] %vm228_vm8, %v4395_v45 }
   0x5   :  { %v54_v14 = vld [vmem:[%s5146_s0 + $0x28] sm:$0xff]  ;;  %v4116_v16 = vpack.c.bf16 %v112_v13, %v111_v12  ;;  %v114_v18 = vld [vmem:[%s5147_s1 + $0x38] sm:$0xff]  ;;  %v55_v20 = vld [vmem:[%s5146_s0 + $0x30] sm:$0xff]  ;;  %230 = vst.msk [vmem:[#allocation2 + $0x8] sm:$0xff] %vm228_vm8, %v4395_v45 }
   0x6   :  { %69 = vperm.xlu1 %4322, %v52_v4   ;;  %63 = vperm.xlu0 %4321, %v50_v5   ;;  %v56_v19 = vld [vmem:[%s5146_s0 + $0x38] sm:$0xff]  ;;  %v4120_v21 = vpack.c.bf16 %v114_v18, %v113_v17  ;;  %v115_v22 = vld [vmem:[%s5147_s1 + $0x40] sm:$0xff]  ;;  %v116_v23 = vld [vmem:[%s5147_s1 + $0x48] sm:$0xff]  ;;  %231 = vst.msk [vmem:[#allocation2 + $0x10] sm:$0xff] %vm228_vm8, %v4395_v45 }
   0x7   :  { %4109 = vmatprep.subr.bf16.mxu0 %v4108_v10  ;;  %v4124_v24 = vpack.c.bf16 %v116_v23, %v115_v22  ;;  %v117_v25 = vld [vmem:[%s5147_s1 + $0x50] sm:$0xff]  ;;  %v118_v26 = vld [vmem:[%s5147_s1 + $0x58] sm:$0xff]  ;;  %v119_v28 = vld [vmem:[%s5147_s1 + $0x60] sm:$0xff]  ;;  %232 = vst.msk [vmem:[#allocation2 + $0x18] sm:$0xff] %vm228_vm8, %v4395_v45 }
   0x8   :  { %4111 = vmatpush3.bf16.msra.mxu0 %v4108_v10  ;;  %v4128_v27 = vpack.c.bf16 %v118_v26, %v117_v25  ;;  %v120_v29 = vld [vmem:[%s5147_s1 + $0x68] sm:$0xff]  ;;  %v121_v31 = vld [vmem:[%s5147_s1 + $0x70] sm:$0xff]  ;;  %v122_v32 = vld [vmem:[%s5147_s1 + $0x78] sm:$0xff]  ;;  %234 = vst.msk [vmem:[#allocation2 + $0x28] sm:$0xff] %vm228_vm8, %v4395_v45 }
   0x9   :  { %4113 = vmatprep.subr.bf16.mxu0 %v4112_v11  ;;  %v4132_v30 = vpack.c.bf16 %v120_v29, %v119_v28  ;;  %v4136_v33 = vpack.c.bf16 %v122_v32, %v121_v31  ;;  %235 = vst.msk [vmem:[#allocation2 + $0x30] sm:$0xff] %vm228_vm8, %v4395_v45  ;;  %236 = vst.msk [vmem:[#allocation2 + $0x38] sm:$0xff] %vm228_vm8, %v4395_v45  ;;  %v259_v46 = vld [vmem:[%s5154_s2] sm:$0xff]  ;;  %v3391_v47 = vld [vmem:[%s5154_s2 + $0x8] sm:$0xff] }
   0xa   :  { %75 = vperm.xlu1 %4322, %v54_v14   ;;  %72 = vperm.xlu0 %4321, %v53_v15   ;;  %237 = vst.msk [vmem:[#allocation2 + $0x40] sm:$0xff] %vm228_vm8, %v4395_v45  ;;  %238 = vst.msk [vmem:[#allocation2 + $0x48] sm:$0xff] %vm228_vm8, %v4395_v45  ;;  %v3408_v50 = vld [vmem:[%s5154_s2 + $0x10] sm:$0xff]  ;;  %v3417_v52 = vld [vmem:[%s5154_s2 + $0x18] sm:$0xff] }
   0xb   :  { %239 = vst.msk [vmem:[#allocation2 + $0x50] sm:$0xff] %vm228_vm8, %v4395_v45  ;;  %240 = vst.msk [vmem:[#allocation2 + $0x58] sm:$0xff] %vm228_vm8, %v4395_v45  ;;  %3827 = vmatprep.subr.mxu1 %v259_v46  ;;  %v251_v48 = vld [vmem:[#allocation2] sm:$0xff]  ;;  %v3435_v6 = vld [vmem:[%s5154_s2 + $0x28] sm:$0xff] }
   0xc   :  { %4115 = vmatpush3.bf16.msra.mxu0 %v4112_v11  ;;  %241 = vst.msk [vmem:[#allocation2 + $0x60] sm:$0xff] %vm228_vm8, %v4395_v45  ;;  %242 = vst.msk [vmem:[#allocation2 + $0x68] sm:$0xff] %vm228_vm8, %v4395_v45  ;;  %3828 = vmatpush3.msra.mxu1 %v259_v46  ;;  %v252_v49 = vld [vmem:[#allocation2 + $0x8] sm:$0xff]  ;;  %v3426_v4 = vld [vmem:[%s5154_s2 + $0x20] sm:$0xff] }
   0xd   :  { %4117 = vmatprep.subr.bf16.mxu0 %v4116_v16  ;;  %3829 = vmatprep.mubr.msk.f32.mxu1 %vm228_vm8, %v251_v48  ;;  %v253_v51 = vld [vmem:[#allocation2 + $0x10] sm:$0xff]  ;;  %v1250_v14 = vld [vmem:[%s5155_s4] sm:$0xff]  ;;  %v1251_v15 = vld [vmem:[%s5155_s4 + $0x8] sm:$0xff] }
   0xe   :  { %81 = vperm.xlu1 %4322, %v56_v19   ;;  %78 = vperm.xlu0 %4321, %v55_v20   ;;  %v3444_v8 = vld [vmem:[%s5154_s2 + $0x30] sm:$0xff]  ;;  %v4140_v17 = vpack.c.bf16 %v1251_v15, %v1250_v14  ;;  %v1253_v18 = vld [vmem:[%s5155_s4 + $0x18] sm:$0xff]  ;;  %v3454_v20 = vld [vmem:[%s5155_s4 + $0x20] sm:$0xff] }
   0xf   :  { %3841 = vmatprep.subr.mxu1 %v3408_v50  ;;  %3830 = vmatmul.mubr.msk.f32.vlgmr.msra.gmra.mrb[0].mxu1 %vm228_vm8, %v252_v49  ;;  %v3453_v31 = vld [vmem:[%s5156_s3] ss:$0 sm:$0xff]  ;;  %v3456_v34 = vld [vmem:[%s5155_s4 + $0x30] sm:$0xff] }
  0x10   :  { %4119 = vmatpush3.bf16.msra.mxu0 %v4116_v16  ;;  %3842 = vmatpush3.msra.mxu1 %v3408_v50  ;;  %v1252_v16 = vld [vmem:[%s5155_s4 + $0x10] sm:$0xff] }
  0x11   :  { %4121 = vmatprep.subr.bf16.mxu0 %v4120_v21  ;;  %3832 = vmatprep.mubr.msk.f32.mxu1 %vm228_vm8, %v253_v51  ;;  %v4144_v19 = vpack.c.bf16 %v1253_v18, %v1252_v16 }
  0x12   :  { %3855 = vmatprep.subr.mxu1 %v3417_v52  ;;  %v801_v9 = vld [vmem:[#allocation2 + $0x58] sm:$0xff] }
  0x13   :  { %v948_v10 = vld [vmem:[#allocation2 + $0x60] sm:$0xff]  ;;  %v1095_v13 = vld [vmem:[#allocation2 + $0x68] sm:$0xff] }
  0x14   :  { %4123 = vmatpush3.bf16.msra.mxu0 %v4120_v21  ;;  %v3455_v21 = vld [vmem:[%s5155_s4 + $0x28] sm:$0xff] }
  0x15   :  { %4125 = vmatprep.subr.bf16.mxu0 %v4124_v24  ;;  %v4148_v22 = vpack.c.bf16 %v3455_v21, %v3454_v20  ;;  %v3468_v20 = vld [vmem:[%s5160_s6 + $0x1] ss:$0 sm:$0xff] }
  0x18   :  { %4127 = vmatpush3.bf16.msra.mxu0 %v4124_v24 }
  0x19   :  { %4129 = vmatprep.subr.bf16.mxu0 %v4128_v27 }
  0x1c   :  { %4131 = vmatpush3.bf16.msra.mxu0 %v4128_v27 }
  0x1d   :  { %4133 = vmatprep.subr.bf16.mxu0 %v4132_v30 }
  0x20   :  { %4135 = vmatpush3.bf16.msra.mxu0 %v4132_v30 }
  0x21   :  { %4137 = vmatprep.subr.bf16.mxu0 %v4136_v33 }
  0x24   :  { %4139 = vmatpush3.bf16.msra.mxu0 %v4136_v33 }
  0x25   :  { %3813 = vmatprep.subr.mxu0 %v3391_v47 }
  0x81   :  { %v67_v36 = vpop.permute.xlu1 %66  ;;  %v61_v37 = vpop.permute.xlu0 %60 }
  0x82   :  { %vm83_vm0 = vcmp.eq.s32.totalorder %v61_v37, %v58_v35  ;;  %vm85_vm1 = vcmp.eq.s32.totalorder %v67_v36, %v58_v35 }
  0x83   :  { %3801 = vmatprep.mubr.msk.f32.mxu0 %vm83_vm0, %v4394_v38 }
  0x85   :  { %v70_v39 = vpop.permute.xlu1 %69  ;;  %v64_v40 = vpop.permute.xlu0 %63 }
  0x86   :  { %vm84_vm2 = vcmp.eq.s32.totalorder %v64_v40, %v58_v35  ;;  %vm86_vm3 = vcmp.eq.s32.totalorder %v70_v39, %v58_v35 }
  0x87   :  { %3802 = vmatmul.mubr.msk.f32.vlgmr.msra.gmra.mrb[0].mxu0 %vm84_vm2, %v4394_v38 }
  0x88   :  { %3804 = vmatprep.mubr.msk.f32.mxu0 %vm85_vm1, %v4394_v38  ;;  %3814 = vmatpush3.msra.mxu0 %v3391_v47 }
  0x89   :  { %v76_v41 = vpop.permute.xlu1 %75  ;;  %v73_v42 = vpop.permute.xlu0 %72  ;;  %4141 = vmatprep.subr.bf16.mxu0 %v4140_v17 }
  0x8a   :  { %vm87_vm4 = vcmp.eq.s32.totalorder %v73_v42, %v58_v35  ;;  %vm88_vm5 = vcmp.eq.s32.totalorder %v76_v41, %v58_v35 }
  0x8b   :  { %3805 = vmatmul.mubr.msk.f32.gmra.mrb[2].mxu0 %vm86_vm3, %v4394_v38 }
  0x8c   :  { %3807 = vmatprep.mubr.msk.f32.mxu0 %vm87_vm4, %v4394_v38 }
  0x8d   :  { %v79_v43 = vpop.permute.xlu0 %78  ;;  %v82_v44 = vpop.permute.xlu1 %81 }
  0x8e   :  { %vm89_vm6 = vcmp.eq.s32.totalorder %v79_v43, %v58_v35  ;;  %vm90_vm7 = vcmp.eq.s32.totalorder %v82_v44, %v58_v35  ;;  %v3457_v35 = vld [vmem:[%s5155_s4 + $0x38] sm:$0xff] }
  0x8f   :  { %3808 = vmatmul.mubr.msk.f32.gmra.mrb[4].mxu0 %vm88_vm5, %v4394_v38  ;;  %v4152_v41 = vpack.c.bf16 %v3457_v35, %v3456_v34 }
  0x90   :  { %3810 = vmatprep.mubr.msk.f32.mxu0 %vm89_vm6, %v4394_v38 }
  0x93   :  { %3811 = vmatmul.mubr.msk.f32.gmra.mrb[6].mxu0 %vm90_vm7, %v4394_v38 }
  0x94   :  { %3815 = vmatprep.mubr.msk.f32.mxu0 %vm228_vm8, %v252_v49 }
  0x97   :  { %3816 = vmatmul.mubr.msk.f32.vlgmr.msra.gmra.mrb[8].mxu0 %vm228_vm8, %v253_v51 }
  0x98   :  { %4143 = vmatpush3.bf16.msra.mxu0 %v4140_v17 }
  0x99   :  { %4145 = vmatprep.subr.bf16.mxu0 %v4144_v19 }
  0x9c   :  { %4147 = vmatpush3.bf16.msra.mxu0 %v4144_v19 }
  0x9d   :  { %4149 = vmatprep.subr.bf16.mxu0 %v4148_v22 }
 0x15a   :  { %v3803_v53 = vpop.f32.mrb[0].mxu0 }
 0x15b   :  { %244 = vst.msk [vmem:[#allocation2 + $0x20] sm:$0xff] %vm228_vm8, %v3803_v53  ;;  %v189_v54 = vpop.f32.mrb[1].mxu0 }
 0x15c   :  { %243 = vst.msk [vmem:[#allocation2 + $0x18] sm:$0xff] %vm228_vm8, %v189_v54 }
 0x15e   :  { %v3806_v55 = vpop.f32.mrb[2].mxu0 }
 0x15f   :  { %246 = vst.msk [vmem:[#allocation2 + $0x30] sm:$0xff] %vm228_vm8, %v3806_v55  ;;  %v199_v56 = vpop.f32.mrb[3].mxu0 }
 0x160   :  { %245 = vst.msk [vmem:[#allocation2 + $0x28] sm:$0xff] %vm228_vm8, %v199_v56 }
 0x162   :  { %v3809_v57 = vpop.f32.mrb[4].mxu0  ;;  %v255_v60 = vld [vmem:[#allocation2 + $0x20] sm:$0xff] }
 0x163   :  { %248 = vst.msk [vmem:[#allocation2 + $0x40] sm:$0xff] %vm228_vm8, %v3809_v57  ;;  %v209_v58 = vpop.f32.mrb[5].mxu0  ;;  %v254_v59 = vld [vmem:[#allocation2 + $0x18] sm:$0xff] }
 0x164   :  { %247 = vst.msk [vmem:[#allocation2 + $0x38] sm:$0xff] %vm228_vm8, %v209_v58  ;;  %3818 = vmatprep.mubr.msk.f32.mxu0 %vm228_vm8, %v254_v59  ;;  %3833 = vmatmul.mubr.msk.f32.gmra.mrb[2].mxu1 %vm228_vm8, %v254_v59  ;;  %v3479_v58 = vld [vmem:[%s5157_s7] ss:$0 sm:$0xff] }
 0x165   :  { %3819 = vmatmul.mubr.msk.f32.gmra.mrb[10].mxu0 %vm228_vm8, %v255_v60  ;;  %3835 = vmatprep.mubr.msk.f32.mxu1 %vm228_vm8, %v255_v60  ;;  %1539 = vst.msk [vmem:[#allocation7] sm:$0xff] %vm1538_vm10, %v3479_v58 }
 0x166   :  { %v3812_v61 = vpop.f32.mrb[6].mxu0  ;;  %v257_v1 = vld [vmem:[#allocation2 + $0x30] sm:$0xff] }
 0x167   :  { %250 = vst.msk [vmem:[#allocation2 + $0x50] sm:$0xff] %vm228_vm8, %v3812_v61  ;;  %v219_v62 = vpop.f32.mrb[7].mxu0  ;;  %v256_v63 = vld [vmem:[#allocation2 + $0x28] sm:$0xff] }
 0x168   :  { %249 = vst.msk [vmem:[#allocation2 + $0x48] sm:$0xff] %vm228_vm8, %v219_v62  ;;  %3821 = vmatprep.mubr.msk.f32.mxu0 %vm228_vm8, %v256_v63  ;;  %3836 = vmatmul.mubr.msk.f32.gmra.mrb[4].mxu1 %vm228_vm8, %v256_v63  ;;  %v4736_v61 = vld [vmem:[%s5159_s5 + $0x8] sm:$0xff]  ;;  %v4741_v62 = vld [vmem:[%s5159_s5 + $0x10] sm:$0xff] }
 0x169   :  { %3822 = vmatmul.mubr.msk.f32.gmra.mrb[12].mxu0 %vm228_vm8, %v257_v1  ;;  %3838 = vmatprep.mubr.msk.f32.mxu1 %vm228_vm8, %v257_v1 }
 0x16a   :  { %v260_v3 = vld [vmem:[#allocation2 + $0x40] sm:$0xff]  ;;  %v3817_v11 = vpop.f32.mrb[8].mxu0 }
 0x16b   :  { %v258_v2 = vld [vmem:[#allocation2 + $0x38] sm:$0xff]  ;;  %v353_v12 = vpop.f32.mrb[9].mxu0 }
 0x16c   :  { %3824 = vmatprep.mubr.msk.f32.mxu0 %vm228_vm8, %v258_v2  ;;  %3839 = vmatmul.mubr.msk.f32.gmra.mrb[6].mxu1 %vm228_vm8, %v258_v2 }
 0x16d   :  { %3825 = vmatmul.mubr.msk.f32.gmra.mrb[14].mxu0 %vm228_vm8, %v260_v3  ;;  %3843 = vmatprep.mubr.msk.f32.mxu1 %vm228_vm8, %v253_v51 }
 0x16e   :  { %v654_v7 = vld [vmem:[#allocation2 + $0x50] sm:$0xff] }
 0x16f   :  { %v507_v5 = vld [vmem:[#allocation2 + $0x48] sm:$0xff] }
 0x170   :  { %3844 = vmatmul.mubr.msk.f32.vlgmr.msra.gmra.mrb[0].mxu1 %vm228_vm8, %v254_v59 }
 0x171   :  { %3856 = vmatpush3.msra.mxu1 %v3417_v52  ;;  %3846 = vmatprep.mubr.msk.f32.mxu1 %vm228_vm8, %v255_v60 }
 0x172   :  { %3869 = vmatprep.subr.mxu1 %v3426_v4 }
 0x174   :  { %3847 = vmatmul.mubr.msk.f32.gmra.mrb[2].mxu1 %vm228_vm8, %v256_v63 }
 0x175   :  { %3849 = vmatprep.mubr.msk.f32.mxu1 %vm228_vm8, %v257_v1 }
 0x178   :  { %3850 = vmatmul.mubr.msk.f32.gmra.mrb[4].mxu1 %vm228_vm8, %v258_v2 }
 0x179   :  { %3852 = vmatprep.mubr.msk.f32.mxu1 %vm228_vm8, %v260_v3 }
 0x17c   :  { %3853 = vmatmul.mubr.msk.f32.gmra.mrb[6].mxu1 %vm228_vm8, %v507_v5 }
 0x17d   :  { %3857 = vmatprep.mubr.msk.f32.mxu1 %vm228_vm8, %v254_v59  ;;  %v3480_v59 = vld [vmem:[%s5158_s8] ss:$0 sm:$0xff] }
 0x17e   :  { %1547 = vst.msk [vmem:[#allocation8] sm:$0xff] %vm1538_vm10, %v3480_v59 }
 0x180   :  { %3858 = vmatmul.mubr.msk.f32.vlgmr.msra.gmra.mrb[0].mxu1 %vm228_vm8, %v255_v60 }
 0x181   :  { %3870 = vmatpush3.msra.mxu1 %v3426_v4  ;;  %3860 = vmatprep.mubr.msk.f32.mxu1 %vm228_vm8, %v256_v63 }
 0x182   :  { %3883 = vmatprep.subr.mxu1 %v3435_v6 }
 0x184   :  { %3861 = vmatmul.mubr.msk.f32.gmra.mrb[2].mxu1 %vm228_vm8, %v257_v1 }
 0x185   :  { %3863 = vmatprep.mubr.msk.f32.mxu1 %vm228_vm8, %v258_v2 }
 0x188   :  { %3864 = vmatmul.mubr.msk.f32.gmra.mrb[4].mxu1 %vm228_vm8, %v260_v3 }
 0x189   :  { %3866 = vmatprep.mubr.msk.f32.mxu1 %vm228_vm8, %v507_v5 }
 0x18c   :  { %3867 = vmatmul.mubr.msk.f32.gmra.mrb[6].mxu1 %vm228_vm8, %v654_v7 }
 0x18d   :  { %3871 = vmatprep.mubr.msk.f32.mxu1 %vm228_vm8, %v255_v60  ;;  %v4731_v60 = vld [vmem:[%s5159_s5] sm:$0xff] }
 0x190   :  { %3872 = vmatmul.mubr.msk.f32.vlgmr.msra.gmra.mrb[0].mxu1 %vm228_vm8, %v256_v63 }
 0x191   :  { %3884 = vmatpush3.msra.mxu1 %v3435_v6  ;;  %3874 = vmatprep.mubr.msk.f32.mxu1 %vm228_vm8, %v257_v1 }
 0x192   :  { %3897 = vmatprep.subr.mxu1 %v3444_v8 }
 0x194   :  { %3875 = vmatmul.mubr.msk.f32.gmra.mrb[2].mxu1 %vm228_vm8, %v258_v2 }
 0x195   :  { %3877 = vmatprep.mubr.msk.f32.mxu1 %vm228_vm8, %v260_v3 }
 0x198   :  { %3878 = vmatmul.mubr.msk.f32.gmra.mrb[4].mxu1 %vm228_vm8, %v507_v5 }
 0x199   :  { %3880 = vmatprep.mubr.msk.f32.mxu1 %vm228_vm8, %v654_v7 }
 0x19c   :  { %3881 = vmatmul.mubr.msk.f32.gmra.mrb[6].mxu1 %vm228_vm8, %v801_v9 }
 0x19d   :  { %3885 = vmatprep.mubr.msk.f32.mxu1 %vm228_vm8, %v256_v63  ;;  %v4748_v63 = vld [vmem:[%s5159_s5 + $0x18] sm:$0xff] }
 0x1a0   :  { %3886 = vmatmul.mubr.msk.f32.vlgmr.msra.gmra.mrb[0].mxu1 %vm228_vm8, %v257_v1 }
 0x1a1   :  { %3898 = vmatpush3.msra.mxu1 %v3444_v8  ;;  %3888 = vmatprep.mubr.msk.f32.mxu1 %vm228_vm8, %v258_v2 }
 0x1a4   :  { %3889 = vmatmul.mubr.msk.f32.gmra.mrb[2].mxu1 %vm228_vm8, %v260_v3 }
 0x1a5   :  { %3891 = vmatprep.mubr.msk.f32.mxu1 %vm228_vm8, %v507_v5 }
 0x1a8   :  { %3892 = vmatmul.mubr.msk.f32.gmra.mrb[4].mxu1 %vm228_vm8, %v654_v7 }
 0x1a9   :  { %3894 = vmatprep.mubr.msk.f32.mxu1 %vm228_vm8, %v801_v9 }
 0x1ac   :  { %3895 = vmatmul.mubr.msk.f32.gmra.mrb[6].mxu1 %vm228_vm8, %v948_v10 }
 0x1ad   :  { %3899 = vmatprep.mubr.msk.f32.mxu1 %vm228_vm8, %v257_v1  ;;  %v3482_v1 = vld [vmem:[%s5157_s7 + $0x1] ss:$0 sm:$0xff] }
 0x1ae   :  { %1556 = vst.msk [vmem:[#allocation9] sm:$0xff] %vm1538_vm10, %v3482_v1 }
 0x1b0   :  { %3900 = vmatmul.mubr.msk.f32.vlgmr.msra.gmra.mrb[0].mxu1 %vm228_vm8, %v258_v2  ;;  %v3484_v2 = vld [vmem:[%s5158_s8 + $0x1] ss:$0 sm:$0xff] }
 0x1b1   :  { %3902 = vmatprep.mubr.msk.f32.mxu1 %vm228_vm8, %v260_v3  ;;  %1565 = vst.msk [vmem:[#allocation10] sm:$0xff] %vm1538_vm10, %v3484_v2  ;;  %v3458_v3 = vld [vmem:[%s5160_s6] ss:$0 sm:$0xff] }
 0x1b4   :  { %3903 = vmatmul.mubr.msk.f32.gmra.mrb[2].mxu1 %vm228_vm8, %v507_v5 }
 0x1b5   :  { %3905 = vmatprep.mubr.msk.f32.mxu1 %vm228_vm8, %v654_v7 }
 0x1b8   :  { %3906 = vmatmul.mubr.msk.f32.gmra.mrb[4].mxu1 %vm228_vm8, %v801_v9 }
 0x1b9   :  { %3908 = vmatprep.mubr.msk.f32.mxu1 %vm228_vm8, %v948_v10 }
 0x1bc   :  { %3909 = vmatmul.mubr.msk.f32.gmra.mrb[6].mxu1 %vm228_vm8, %v1095_v13 }
 0x238   :  { %v3820_v23 = vpop.f32.mrb[10].mxu0 }
 0x239   :  { %v363_v24 = vpop.f32.mrb[11].mxu0 }
 0x23c   :  { %v3823_v25 = vpop.f32.mrb[12].mxu0 }
 0x23d   :  { %v373_v26 = vpop.f32.mrb[13].mxu0 }
 0x240   :  { %v3826_v27 = vpop.f32.mrb[14].mxu0 }
 0x241   :  { %v383_v28 = vpop.f32.mrb[15].mxu0 }
 0x283   :  { %v3901_v29 = vpop.f32.mrb[0].mxu1 }
 0x284   :  { %v4210_v30 = vadd.f32 %v3901_v29, %v3817_v11  ;;  %v1188_v32 = vpop.f32.mrb[1].mxu1 }
 0x285   :  { %v4211_v33 = vadd.f32 %v1188_v32, %v353_v12 }
 0x286   :  { %v1243_v38 = vadd.f32 %v4210_v30, %v3453_v31 }
 0x287   :  { %v1242_v36 = vadd.f32 %v4211_v33, %v3453_v31  ;;  %v3904_v37 = vpop.f32.mrb[2].mxu1 }
 0x288   :  { %v4212_v39 = vadd.f32 %v3904_v37, %v3820_v23  ;;  %v1198_v40 = vpop.f32.mrb[3].mxu1 }
 0x289   :  { %v4213_v42 = vadd.f32 %v1198_v40, %v363_v24  ;;  %3919 = vmatprep.mubr.msk.f32.mxu0 %vm1266_vm9, %v1242_v36 }
 0x28a   :  { %3920 = vmatmul.mubr.msk.f32.vlgmr.msra.gmra.mrb[16].mxu0 %vm1266_vm9, %v1243_v38  ;;  %v1245_v46 = vadd.f32 %v4212_v39, %v3453_v31 }
 0x28b   :  { %v1244_v43 = vadd.f32 %v4213_v42, %v3453_v31  ;;  %4151 = vmatpush3.bf16.msra.mxu0 %v4148_v22  ;;  %v3907_v44 = vpop.f32.mrb[4].mxu1 }
 0x28c   :  { %v4214_v47 = vadd.f32 %v3907_v44, %v3823_v25  ;;  %v1208_v48 = vpop.f32.mrb[5].mxu1  ;;  %4153 = vmatprep.subr.bf16.mxu0 %v4152_v41 }
 0x28d   :  { %v4215_v49 = vadd.f32 %v1208_v48, %v373_v26  ;;  %3922 = vmatprep.mubr.msk.f32.mxu0 %vm1266_vm9, %v1244_v43 }
 0x28e   :  { %3923 = vmatmul.mubr.msk.f32.gmra.mrb[18].mxu0 %vm1266_vm9, %v1245_v46  ;;  %v1247_v52 = vadd.f32 %v4214_v47, %v3453_v31 }
 0x28f   :  { %v1246_v50 = vadd.f32 %v4215_v49, %v3453_v31  ;;  %v3910_v51 = vpop.f32.mrb[6].mxu1  ;;  %4155 = vmatpush3.bf16.msra.mxu0 %v4152_v41 }
 0x290   :  { %v4216_v53 = vadd.f32 %v3910_v51, %v3826_v27  ;;  %v1218_v54 = vpop.f32.mrb[7].mxu1 }
 0x291   :  { %v4217_v55 = vadd.f32 %v1218_v54, %v383_v28  ;;  %3925 = vmatprep.mubr.msk.f32.mxu0 %vm1266_vm9, %v1246_v50 }
 0x292   :  { %3926 = vmatmul.mubr.msk.f32.gmra.mrb[20].mxu0 %vm1266_vm9, %v1247_v52  ;;  %v1249_v57 = vadd.f32 %v4216_v53, %v3453_v31 }
 0x293   :  { %v1248_v56 = vadd.f32 %v4217_v55, %v3453_v31 }
 0x295   :  { %3928 = vmatprep.mubr.msk.f32.mxu0 %vm1266_vm9, %v1248_v56 }
 0x296   :  { %3929 = vmatmul.mubr.msk.f32.gmra.mrb[22].mxu0 %vm1266_vm9, %v1249_v57 }
 0x297   :  { %3939 = vmatprep.mubr.msk.f32.mxu0 %vm1266_vm9, %v1242_v36 }
 0x29a   :  { %3940 = vmatmul.mubr.msk.f32.vlgmr.msra.gmra.mrb[24].mxu0 %vm1266_vm9, %v1243_v38 }
 0x29b   :  { %3942 = vmatprep.mubr.msk.f32.mxu0 %vm1266_vm9, %v1244_v43 }
 0x29e   :  { %3943 = vmatmul.mubr.msk.f32.gmra.mrb[26].mxu0 %vm1266_vm9, %v1245_v46 }
 0x29f   :  { %3945 = vmatprep.mubr.msk.f32.mxu0 %vm1266_vm9, %v1246_v50 }
 0x2a2   :  { %3946 = vmatmul.mubr.msk.f32.gmra.mrb[28].mxu0 %vm1266_vm9, %v1247_v52 }
 0x2a3   :  { %3948 = vmatprep.mubr.msk.f32.mxu0 %vm1266_vm9, %v1248_v56 }
 0x2a6   :  { %3949 = vmatmul.mubr.msk.f32.gmra.mrb[30].mxu0 %vm1266_vm9, %v1249_v57 }
 0x35d   :  { %v3921_v4 = vpop.f32.mrb[16].mxu0 }
 0x35e   :  { %v1363_v5 = vadd.f32 %v3921_v4, %v3458_v3  ;;  %v1357_v6 = vpop.f32.mrb[17].mxu0 }
 0x35f   :  { %v1358_v7 = vadd.f32 %v3458_v3, %v1357_v6 }
 0x360   :  { %1398 = vst.msk [vmem:[#allocation3 + $0x8] sm:$0xff] %vm1396_vm11, %v1363_v5 }
 0x361   :  { %1397 = vst.msk [vmem:[#allocation3] sm:$0xff] %vm1396_vm11, %v1358_v7  ;;  %v3924_v8 = vpop.f32.mrb[18].mxu0 }
 0x362   :  { %v1373_v9 = vadd.f32 %v3924_v8, %v3458_v3  ;;  %v1367_v10 = vpop.f32.mrb[19].mxu0 }
 0x363   :  { %v1368_v11 = vadd.f32 %v3458_v3, %v1367_v10 }
 0x364   :  { %1400 = vst.msk [vmem:[#allocation3 + $0x18] sm:$0xff] %vm1396_vm11, %v1373_v9 }
 0x365   :  { %1399 = vst.msk [vmem:[#allocation3 + $0x10] sm:$0xff] %vm1396_vm11, %v1368_v11  ;;  %v3927_v12 = vpop.f32.mrb[20].mxu0 }
 0x366   :  { %v1383_v13 = vadd.f32 %v3927_v12, %v3458_v3  ;;  %v1377_v14 = vpop.f32.mrb[21].mxu0 }
 0x367   :  { %v1378_v15 = vadd.f32 %v3458_v3, %v1377_v14 }
 0x368   :  { %1402 = vst.msk [vmem:[#allocation3 + $0x28] sm:$0xff] %vm1396_vm11, %v1383_v13 }
 0x369   :  { %1401 = vst.msk [vmem:[#allocation3 + $0x20] sm:$0xff] %vm1396_vm11, %v1378_v15  ;;  %v3930_v16 = vpop.f32.mrb[22].mxu0 }
 0x36a   :  { %v1393_v17 = vadd.f32 %v3930_v16, %v3458_v3  ;;  %v1387_v18 = vpop.f32.mrb[23].mxu0 }
 0x36b   :  { %v1388_v19 = vadd.f32 %v3458_v3, %v1387_v18 }
 0x36c   :  { %1404 = vst.msk [vmem:[#allocation3 + $0x38] sm:$0xff] %vm1396_vm11, %v1393_v17 }
 0x36d   :  { %1403 = vst.msk [vmem:[#allocation3 + $0x30] sm:$0xff] %vm1396_vm11, %v1388_v19  ;;  %v3941_v21 = vpop.f32.mrb[24].mxu0 }
 0x36e   :  { %v1485_v22 = vadd.f32 %v3941_v21, %v3468_v20  ;;  %v1479_v23 = vpop.f32.mrb[25].mxu0 }
 0x36f   :  { %v1480_v24 = vadd.f32 %v3468_v20, %v1479_v23 }
 0x370   :  { %1519 = vst.msk [vmem:[#allocation4 + $0x8] sm:$0xff] %vm1396_vm11, %v1485_v22 }
 0x371   :  { %1518 = vst.msk [vmem:[#allocation4] sm:$0xff] %vm1396_vm11, %v1480_v24  ;;  %v3944_v25 = vpop.f32.mrb[26].mxu0 }
 0x372   :  { %v1495_v26 = vadd.f32 %v3944_v25, %v3468_v20  ;;  %v1489_v27 = vpop.f32.mrb[27].mxu0 }
 0x373   :  { %v1490_v28 = vadd.f32 %v3468_v20, %v1489_v27 }
 0x374   :  { %1521 = vst.msk [vmem:[#allocation4 + $0x18] sm:$0xff] %vm1396_vm11, %v1495_v26 }
 0x375   :  { %1520 = vst.msk [vmem:[#allocation4 + $0x10] sm:$0xff] %vm1396_vm11, %v1490_v28  ;;  %v3947_v29 = vpop.f32.mrb[28].mxu0 }
 0x376   :  { %v1505_v30 = vadd.f32 %v3947_v29, %v3468_v20  ;;  %v1499_v31 = vpop.f32.mrb[29].mxu0 }
 0x377   :  { %v1500_v32 = vadd.f32 %v3468_v20, %v1499_v31 }
 0x378   :  { %1523 = vst.msk [vmem:[#allocation4 + $0x28] sm:$0xff] %vm1396_vm11, %v1505_v30 }
 0x379   :  { %1522 = vst.msk [vmem:[#allocation4 + $0x20] sm:$0xff] %vm1396_vm11, %v1500_v32  ;;  %v3950_v33 = vpop.f32.mrb[30].mxu0 }
 0x37a   :  { %v1515_v34 = vadd.f32 %v3950_v33, %v3468_v20  ;;  %v1509_v35 = vpop.f32.mrb[31].mxu0 }
 0x37b   :  { %v1510_v36 = vadd.f32 %v3468_v20, %v1509_v35 }
 0x37c   :  { %1525 = vst.msk [vmem:[#allocation4 + $0x38] sm:$0xff] %vm1396_vm11, %v1515_v34 }
 0x37d   :  { %1524 = vst.msk [vmem:[#allocation4 + $0x30] sm:$0xff] %vm1396_vm11, %v1510_v36 }
 0x37e LB: > { %v4157_v37 = vpack.c.bf16 %v4736_v61, %v4731_v60  ;;  %v4396_v38 = vmov 0.0|0.0   ;;  %vm4397_vm12 = vmmov 0   ;;  %v4398_v39 = vmov 0.0   ;;  %v1651_v41 = vld [vmem:[#allocation8] sm:$0xff]  ;;  %v1576_v42 = vld [vmem:[#allocation7] sm:$0xff]  ;;  %v1695_v43 = vld [vmem:[#allocation9] sm:$0xff]  ;;  %s4387_s20 = sphi %s4780_s20, %s1571_s20  }
 0x37f   : > { %4156 = vmatprep.subr.bf16.mxu0 %v4396_v38  ;;  %3955 = vmatprep.mubr.msk.f32.mxu0 %vm4397_vm12, %v4398_v39  ;;  %v4160_v40 = vpack.c.bf16 %v4748_v63, %v4741_v62  ;;  %s4399_s3 = smov 16   ;;  %v1770_v44 = vld [vmem:[#allocation10] sm:$0xff]  ;;  %s1572_s21 = ssub.s32 7, %s4387_s20 }
 0x380   : > { %4158 = vmatpush3.bf16.msra.mxu0 %v4157_v37  ;;  %4159 = vmatprep.subr.bf16.mxu1 %v4396_v38  ;;  %s3485_s22 = sshll.u32 %s4387_s20, 3  ;;  %s4795_s2 = sshll.u32 %s1572_s21, 3 }
 0x381   : > { %4161 = vmatpush3.bf16.msra.mxu1 %v4160_v40  ;;  %3962 = vmatprep.mubr.msk.f32.mxu1 %vm4397_vm12, %v4398_v39  ;;  %s1574_s23 = scalar_lea.vmem [#allocation3], %s3485_s22  ;;  %s1693_s24 = scalar_lea.vmem [#allocation4], %s4795_s2 }
 0x382   : > { %1660 = vrot.lane.b32.xlu1 %v1651_v41, %s4399_s3  ;;  %v1575_v46 = vld [vmem:[%s1574_s23] sm:$0xff]  ;;  %s4400_s25 = smov 96   ;;  %s4401_s26 = smov 32  }
 0x383   : > { %3956 = vmatmul.mubr.msk.f32.vlgmr.msra.gmra.mrb[0].mxu0 %vm1538_vm10, %v1576_v42  ;;  %s4402_s13 = smov 112   ;;  %s4403_s1 = smov 80  }
 0x384   : > { %3963 = vmatmul.mubr.msk.f32.vlgmr.msra.gmra.mrb[0].mxu1 %vm1538_vm10, %v1695_v43  ;;  %v1694_v47 = vld [vmem:[%s1693_s24] sm:$0xff]  ;;  %s1690_s27 = scalar_lea.vmem [#allocation5], %s3485_s22  ;;  %s1809_s28 = scalar_lea.vmem [#allocation6], %s4795_s2 }
 0x385   : > { %s1571_s20 = sadd.s32 1, %s4387_s20  }
 0x386   : > { %1779 = vrot.lane.b32.xlu1 %v1770_v44, %s4399_s3  ;;  %p1568_p0 = scmp.ge.s32.totalorder %s1571_s20, 8  }
 0x387   :  { %v3491_v29 = vld [vmem:[%s5155_s4 + $0x50] sm:$0xff] (%p1568_p0)  ;;  %v3492_v30 = vld [vmem:[%s5155_s4 + $0x58] sm:$0xff] (%p1568_p0)  ;;  %v3489_v60 = vld [vmem:[%s5155_s4 + $0x40] sm:$0xff] (%p1568_p0) }
 0x388   :  { %v3495_v31 = vld [vmem:[%s5155_s4 + $0x70] sm:$0xff] (%p1568_p0)  ;;  %v4162_v32 = vpack.c.bf16 (%p1568_p0), %v3492_v30, %v3491_v29  ;;  %v3496_v33 = vld [vmem:[%s5155_s4 + $0x78] sm:$0xff] (%p1568_p0)  ;;  %v3490_v61 = vld [vmem:[%s5155_s4 + $0x48] sm:$0xff] (%p1568_p0) }
 0x389   :  { %v4170_v35 = vpack.c.bf16 (%p1568_p0), %v3496_v33, %v3495_v31  ;;  %v3493_v62 = vld [vmem:[%s5155_s4 + $0x60] sm:$0xff] (%p1568_p0)  ;;  %v4166_v63 = vpack.c.bf16 (%p1568_p0), %v3490_v61, %v3489_v60  ;;  %v3494_v36 = vld [vmem:[%s5155_s4 + $0x68] sm:$0xff] (%p1568_p0) }
 0x38a   :  { %4163 = vmatprep.subr.bf16.mxu0 (%p1568_p0), %v4162_v32  ;;  %v4174_v38 = vpack.c.bf16 (%p1568_p0), %v3494_v36, %v3493_v62 }
 0x38b   :  { %4171 = vmatprep.subr.bf16.mxu1 (%p1568_p0), %v4170_v35  ;;  %4165 = vmatpush3.bf16.msra.mxu0 (%p1568_p0), %v4162_v32 }
 0x38c   :  { %4173 = vmatpush3.bf16.msra.mxu1 (%p1568_p0), %v4170_v35  ;;  %4167 = vmatprep.subr.bf16.mxu0 (%p1568_p0), %v4166_v63 }
 0x38d   :  { %4175 = vmatprep.subr.bf16.mxu1 (%p1568_p0), %v4174_v38 }
 0x3f4   : > { %v1661_v11 = vpop.permute.xlu1 %1660 }
 0x3f8   : > { %v1780_v13 = vpop.permute.xlu1 %1779 }
 0x456   : > { %v1646_v48 = vpop.f32.mrb[0].mxu0 }
 0x457   : > { %v1650_v49 = vadd.f32 %v1646_v48, %v1575_v46  ;;  %v3957_v50 = vpop.f32.mrb[1].mxu0  ;;  %v1765_v51 = vpop.f32.mrb[0].mxu1 }
 0x458   : > { %v1769_v52 = vadd.f32 %v1765_v51, %v1694_v47  ;;  %v3964_v53 = vpop.f32.mrb[1].mxu1 }
 0x459   : > { %4323 = vtanh.f32 %v1650_v49  ;;  %v1652_v56 = vsub.f32 0.0, %v1650_v49 }
 0x45a   : > { %4325 = vtanh.f32 %v1769_v52  ;;  %v1771_v58 = vsub.f32 0.0, %v1769_v52 }
 0x45b   : > { %v1653_v57 = vmul.f32 1.442695, %v1652_v56  ;;  %v3542_v56 = vld [vmem:[%s5157_s7 + $0x3] ss:$0 sm:$0xff] (%p1568_p0) }
 0x45c   : > { %v1772_v59 = vmul.f32 1.442695, %v1771_v58  ;;  %v4887_v58 = vld [vmem:[%s5159_s5 + $0x28] sm:$0xff] (%p1568_p0) }
 0x45d   : > { %4327 = vpow2.f32 %v1653_v57  ;;  %v4882_v57 = vld [vmem:[%s5159_s5 + $0x20] sm:$0xff] (%p1568_p0) }
 0x45e   : > { %4329 = vpow2.f32 %v1772_v59  ;;  %v4892_v59 = vld [vmem:[%s5159_s5 + $0x30] sm:$0xff] (%p1568_p0) }
 0x463   : > { %v4324_v54 = vpop.eup %4323 }
 0x464   : > { %1665 = vrot.lane.b32.xlu0 %v4324_v54, %s4400_s25  ;;  %v4326_v55 = vpop.eup %4325  ;;  %v3538_v54 = vld [vmem:[%s5157_s7 + $0x2] ss:$0 sm:$0xff] (%p1568_p0) }
 0x467   : > { %v4328_v1 = vpop.eup %4327 }
 0x468   : > { %1784 = vrot.lane.b32.xlu0 %v4326_v55, %s4400_s25  ;;  %v1655_v2 = vadd.f32 1.0, %v4328_v1  ;;  %v4330_v3 = vpop.eup %4329  ;;  %v3540_v55 = vld [vmem:[%s5158_s8 + $0x2] ss:$0 sm:$0xff] (%p1568_p0)  ;;  %v4900_v1 = vld [vmem:[%s5159_s5 + $0x38] sm:$0xff] (%p1568_p0)  ;;  %s4928_s5 = smov (%p1568_p0), 0  }
 0x469   : > { %v1774_v4 = vadd.f32 1.0, %v4330_v3  ;;  %v3530_v3 = vld [vmem:[%s5160_s6 + $0x2] ss:$0 sm:$0xff] (%p1568_p0) }
 0x46a   : > { %4331 = vrcp.f32 %v1655_v2  ;;  %v3544_v2 = vld [vmem:[%s5158_s8 + $0x3] ss:$0 sm:$0xff] (%p1568_p0) }
 0x46b   : > { %4333 = vrcp.f32 %v1774_v4  ;;  %v3532_v4 = vld [vmem:[%s5160_s6 + $0x3] ss:$0 sm:$0xff] (%p1568_p0) }
 0x474   : > { %v4332_v5 = vpop.eup %4331 }
 0x475   : > { %v4334_v8 = vpop.eup %4333  ;;  %v1663_v12 = vmul.f32 %v4332_v5, %v1661_v11 }
 0x476   : > { %v1782_v16 = vmul.f32 %v4334_v8, %v1780_v13 }
 0x4d6   : > { %v1666_v6 = vpop.permute.xlu0 %1665 }
 0x4d7   : > { %v1668_v7 = vmul.f32 %v4332_v5, %v1666_v6 }
 0x4d9   : > { %1670 = vrot.lane.b32.xlu0 %v1668_v7, %s4399_s3 }
 0x4da   : > { %v1785_v9 = vpop.permute.xlu0 %1784 }
 0x4db   : > { %v1787_v10 = vmul.f32 %v4334_v8, %v1785_v9 }
 0x4dd   : > { %1789 = vrot.lane.b32.xlu1 %v1787_v10, %s4399_s3 }
 0x54b   : > { %v1671_v14 = vpop.permute.xlu0 %1670 }
 0x54c   : > { %v1673_v15 = vadd.f32 %v1671_v14, %v1663_v12 }
 0x54e   : > { %4335 = vtanh.f32 %v1673_v15 }
 0x54f   : > { %v1790_v17 = vpop.permute.xlu1 %1789 }
 0x550   : > { %v1792_v18 = vadd.f32 %v1790_v17, %v1782_v16 }
 0x552   : > { %4337 = vtanh.f32 %v1792_v18 }
 0x558   : > { %v4336_v19 = vpop.eup %4335 }
 0x559   : > { %1676 = vrot.lane.b32.xlu0 %v4336_v19, %s4401_s26 }
 0x55c   : > { %v4338_v20 = vpop.eup %4337 }
 0x55d   : > { %1795 = vrot.lane.b32.xlu1 %v4338_v20, %s4401_s26 }
 0x561   : > { %1686 = vrot.lane.b32.xlu1 %v1673_v15, %s4402_s13 }
 0x565   : > { %1805 = vrot.lane.b32.xlu1 %v1792_v18, %s4402_s13 }
 0x5cb   : > { %v1677_v21 = vpop.permute.xlu0 %1676 }
 0x5cc   : > { %v1679_v22 = vmul.f32 %v4332_v5, %v1677_v21 }
 0x5ce   : > { %1681 = vrot.lane.b32.xlu0 %v1679_v22, %s4403_s1 }
 0x5cf   : > { %v1796_v23 = vpop.permute.xlu1 %1795 }
 0x5d0   : > { %v1798_v24 = vmul.f32 %v4334_v8, %v1796_v23 }
 0x5d2   : > { %1800 = vrot.lane.b32.xlu0 %v1798_v24, %s4403_s1 }
 0x5d3   : > { %v1687_v25 = vpop.permute.xlu1 %1686 }
 0x5d4   : > { %1689 = vst.msk [vmem:[#allocation8] sm:$0xff] %vm1538_vm10, %v1687_v25 }
 0x5d5   :  { %2376 = vst.msk [vmem:[#allocation8] sm:$0xff] (%p1568_p0), %vm1538_vm10, %v3540_v55 }
 0x5d7   : > { %v1806_v26 = vpop.permute.xlu1 %1805 }
 0x5d8   : > { %1808 = vst.msk [vmem:[#allocation10] sm:$0xff] %vm1538_vm10, %v1806_v26 }
 0x5d9   :  { %2394 = vst.msk [vmem:[#allocation10] sm:$0xff] (%p1568_p0), %vm1538_vm10, %v3544_v2 }
 0x63f   :  { %1570 = sbr.rel (!%p1568_p0) target bundleno = 894 (0x37e), region = 119 }
 0x640   : > { %v1682_v27 = vpop.permute.xlu0 %1681 }
 0x641   : > { %1684 = vst.msk [vmem:[#allocation7] sm:$0xff] %vm1538_vm10, %v1682_v27  ;;  %1691 = vst.msk [vmem:[%s1690_s27] sm:$0xff] %vm1538_vm10, %v1682_v27 }
 0x642   :  { %2367 = vst.msk [vmem:[#allocation7] sm:$0xff] (%p1568_p0), %vm1538_vm10, %v3538_v54 }
 0x644   : > { %v1801_v28 = vpop.permute.xlu0 %1800 }
 0x645   : > { %1803 = vst.msk [vmem:[#allocation9] sm:$0xff] %vm1538_vm10, %v1801_v28  ;;  %1810 = vst.msk [vmem:[%s1809_s28] sm:$0xff] %vm1538_vm10, %v1801_v28 }
 0x646   :  { %2385 = vst.msk [vmem:[#allocation9] sm:$0xff] %vm1538_vm10, %v3542_v56 }
 0x648   :  { %v1821_v46 = vld [vmem:[#allocation5] sm:$0xff]  ;;  %v1822_v47 = vld [vmem:[#allocation5 + $0x8] sm:$0xff]  ;;  %v1823_v48 = vld [vmem:[#allocation5 + $0x10] sm:$0xff] }
 0x649   :  { %v1824_v49 = vld [vmem:[#allocation5 + $0x18] sm:$0xff]  ;;  %v1825_v50 = vld [vmem:[#allocation5 + $0x20] sm:$0xff]  ;;  %v1826_v51 = vld [vmem:[#allocation5 + $0x28] sm:$0xff] }
 0x64a   :  { %v1827_v52 = vld [vmem:[#allocation5 + $0x30] sm:$0xff]  ;;  %v1828_v53 = vld [vmem:[#allocation5 + $0x38] sm:$0xff] }
 0x64c   :  { %v1829_v34 = vld [vmem:[#allocation6] sm:$0xff]  ;;  %v1830_v37 = vld [vmem:[#allocation6 + $0x8] sm:$0xff]  ;;  %v1831_v39 = vld [vmem:[#allocation6 + $0x10] sm:$0xff] }
 0x64d   :  { %3969 = vmatprep.mubr.msk.f32.mxu0 %vm1538_vm10, %v1829_v34  ;;  %4001 = vmatprep.mubr.msk.f32.mxu1 %vm1538_vm10, %v1829_v34  ;;  %v1832_v40 = vld [vmem:[#allocation6 + $0x18] sm:$0xff]  ;;  %v1833_v41 = vld [vmem:[#allocation6 + $0x20] sm:$0xff]  ;;  %v1834_v42 = vld [vmem:[#allocation6 + $0x28] sm:$0xff] }
 0x64e   :  { %3970 = vmatmul.mubr.msk.f32.vlgmr.msra.gmra.mrb[0].mxu0 %vm1538_vm10, %v1830_v37  ;;  %4002 = vmatmul.mubr.msk.f32.vlgmr.msra.gmra.mrb[0].mxu1 %vm1538_vm10, %v1830_v37  ;;  %v1835_v43 = vld [vmem:[#allocation6 + $0x30] sm:$0xff]  ;;  %v1836_v44 = vld [vmem:[#allocation6 + $0x38] sm:$0xff] }
 0x64f   :  { %4169 = vmatpush3.bf16.msra.mxu0 %v4166_v63  ;;  %4177 = vmatpush3.bf16.msra.mxu1 %v4174_v38 }
 0x650   :  { %3972 = vmatprep.mubr.msk.f32.mxu0 %vm1538_vm10, %v1831_v39  ;;  %4004 = vmatprep.mubr.msk.f32.mxu1 %vm1538_vm10, %v1831_v39 }
 0x652   :  { %3973 = vmatmul.mubr.msk.f32.gmra.mrb[2].mxu0 %vm1538_vm10, %v1832_v40  ;;  %4005 = vmatmul.mubr.msk.f32.gmra.mrb[2].mxu1 %vm1538_vm10, %v1832_v40 }
 0x653   :  { %3975 = vmatprep.mubr.msk.f32.mxu0 %vm1538_vm10, %v1833_v41  ;;  %4007 = vmatprep.mubr.msk.f32.mxu1 %vm1538_vm10, %v1833_v41 }
 0x656   :  { %3976 = vmatmul.mubr.msk.f32.gmra.mrb[4].mxu0 %vm1538_vm10, %v1834_v42  ;;  %4008 = vmatmul.mubr.msk.f32.gmra.mrb[4].mxu1 %vm1538_vm10, %v1834_v42 }
 0x657   :  { %3978 = vmatprep.mubr.msk.f32.mxu0 %vm1538_vm10, %v1835_v43  ;;  %4010 = vmatprep.mubr.msk.f32.mxu1 %vm1538_vm10, %v1835_v43 }
 0x65a   :  { %3979 = vmatmul.mubr.msk.f32.gmra.mrb[6].mxu0 %vm1538_vm10, %v1836_v44  ;;  %4011 = vmatmul.mubr.msk.f32.gmra.mrb[6].mxu1 %vm1538_vm10, %v1836_v44 }
 0x65b   :  { %3985 = vmatprep.mubr.msk.f32.mxu0 %vm1538_vm10, %v1821_v46  ;;  %4017 = vmatprep.mubr.msk.f32.mxu1 %vm1538_vm10, %v1821_v46 }
 0x65e   :  { %3986 = vmatmul.mubr.msk.f32.vlgmr.msra.gmra.mrb[0].mxu0 %vm1538_vm10, %v1822_v47  ;;  %4018 = vmatmul.mubr.msk.f32.vlgmr.msra.gmra.mrb[0].mxu1 %vm1538_vm10, %v1822_v47 }
 0x65f   :  { %3988 = vmatprep.mubr.msk.f32.mxu0 %vm1538_vm10, %v1823_v48  ;;  %4020 = vmatprep.mubr.msk.f32.mxu1 %vm1538_vm10, %v1823_v48 }
 0x662   :  { %3989 = vmatmul.mubr.msk.f32.gmra.mrb[2].mxu0 %vm1538_vm10, %v1824_v49  ;;  %4021 = vmatmul.mubr.msk.f32.gmra.mrb[2].mxu1 %vm1538_vm10, %v1824_v49 }
 0x663   :  { %3991 = vmatprep.mubr.msk.f32.mxu0 %vm1538_vm10, %v1825_v50  ;;  %4023 = vmatprep.mubr.msk.f32.mxu1 %vm1538_vm10, %v1825_v50 }
 0x666   :  { %3992 = vmatmul.mubr.msk.f32.gmra.mrb[4].mxu0 %vm1538_vm10, %v1826_v51  ;;  %4024 = vmatmul.mubr.msk.f32.gmra.mrb[4].mxu1 %vm1538_vm10, %v1826_v51 }
 0x667   :  { %3994 = vmatprep.mubr.msk.f32.mxu0 %vm1538_vm10, %v1827_v52  ;;  %4026 = vmatprep.mubr.msk.f32.mxu1 %vm1538_vm10, %v1827_v52 }
 0x66a   :  { %3995 = vmatmul.mubr.msk.f32.gmra.mrb[6].mxu0 %vm1538_vm10, %v1828_v53  ;;  %4027 = vmatmul.mubr.msk.f32.gmra.mrb[6].mxu1 %vm1538_vm10, %v1828_v53 }
 0x731   :  { %v3987_v5 = vpop.f32.mrb[0].mxu0  ;;  %v4019_v7 = vpop.f32.mrb[0].mxu1 }
 0x732   :  { %v2314_v6 = vadd.f32 %v3987_v5, %v3530_v3  ;;  %v2056_v8 = vpop.f32.mrb[1].mxu0  ;;  %v2338_v9 = vadd.f32 %v4019_v7, %v3532_v4  ;;  %v2266_v11 = vpop.f32.mrb[1].mxu1 }
 0x733   :  { %v2313_v10 = vadd.f32 %v3530_v3, %v2056_v8  ;;  %v2337_v12 = vadd.f32 %v3532_v4, %v2266_v11 }
 0x734   :  { %2322 = vst.msk [vmem:[#allocation3 + $0x8] sm:$0xff] %vm1396_vm11, %v2314_v6  ;;  %2346 = vst.msk [vmem:[#allocation4 + $0x8] sm:$0xff] %vm1396_vm11, %v2338_v9 }
 0x735   :  { %2321 = vst.msk [vmem:[#allocation3] sm:$0xff] %vm1396_vm11, %v2313_v10  ;;  %v3990_v13 = vpop.f32.mrb[2].mxu0  ;;  %2345 = vst.msk [vmem:[#allocation4] sm:$0xff] %vm1396_vm11, %v2337_v12  ;;  %v4022_v15 = vpop.f32.mrb[2].mxu1 }
 0x736   :  { %v2316_v14 = vadd.f32 %v3990_v13, %v3530_v3  ;;  %v2066_v16 = vpop.f32.mrb[3].mxu0  ;;  %v2340_v17 = vadd.f32 %v4022_v15, %v3532_v4  ;;  %v2276_v19 = vpop.f32.mrb[3].mxu1 }
 0x737   :  { %v2315_v18 = vadd.f32 %v3530_v3, %v2066_v16  ;;  %v2339_v20 = vadd.f32 %v3532_v4, %v2276_v19 }
 0x738   :  { %2324 = vst.msk [vmem:[#allocation3 + $0x18] sm:$0xff] %vm1396_vm11, %v2316_v14  ;;  %2348 = vst.msk [vmem:[#allocation4 + $0x18] sm:$0xff] %vm1396_vm11, %v2340_v17 }
 0x739   :  { %2323 = vst.msk [vmem:[#allocation3 + $0x10] sm:$0xff] %vm1396_vm11, %v2315_v18  ;;  %v3993_v21 = vpop.f32.mrb[4].mxu0  ;;  %2347 = vst.msk [vmem:[#allocation4 + $0x10] sm:$0xff] %vm1396_vm11, %v2339_v20  ;;  %v4025_v23 = vpop.f32.mrb[4].mxu1 }
 0x73a   :  { %v2318_v22 = vadd.f32 %v3993_v21, %v3530_v3  ;;  %v2076_v24 = vpop.f32.mrb[5].mxu0  ;;  %v2342_v25 = vadd.f32 %v4025_v23, %v3532_v4  ;;  %v2286_v27 = vpop.f32.mrb[5].mxu1 }
 0x73b   :  { %v2317_v26 = vadd.f32 %v3530_v3, %v2076_v24  ;;  %v2341_v28 = vadd.f32 %v3532_v4, %v2286_v27 }
 0x73c   :  { %2326 = vst.msk [vmem:[#allocation3 + $0x28] sm:$0xff] %vm1396_vm11, %v2318_v22  ;;  %2350 = vst.msk [vmem:[#allocation4 + $0x28] sm:$0xff] %vm1396_vm11, %v2342_v25 }
 0x73d   :  { %2325 = vst.msk [vmem:[#allocation3 + $0x20] sm:$0xff] %vm1396_vm11, %v2317_v26  ;;  %v3996_v29 = vpop.f32.mrb[6].mxu0  ;;  %2349 = vst.msk [vmem:[#allocation4 + $0x20] sm:$0xff] %vm1396_vm11, %v2341_v28  ;;  %v4028_v31 = vpop.f32.mrb[6].mxu1 }
 0x73e   :  { %v2320_v30 = vadd.f32 %v3996_v29, %v3530_v3  ;;  %v2086_v32 = vpop.f32.mrb[7].mxu0  ;;  %v2344_v33 = vadd.f32 %v4028_v31, %v3532_v4  ;;  %v2296_v35 = vpop.f32.mrb[7].mxu1 }
 0x73f   :  { %v2319_v34 = vadd.f32 %v3530_v3, %v2086_v32  ;;  %v2343_v60 = vadd.f32 %v3532_v4, %v2296_v35 }
 0x740   :  { %2328 = vst.msk [vmem:[#allocation3 + $0x38] sm:$0xff] %vm1396_vm11, %v2320_v30  ;;  %2352 = vst.msk [vmem:[#allocation4 + $0x38] sm:$0xff] %vm1396_vm11, %v2344_v33 }
 0x741   :  { %2327 = vst.msk [vmem:[#allocation3 + $0x30] sm:$0xff] %vm1396_vm11, %v2319_v34  ;;  %2351 = vst.msk [vmem:[#allocation4 + $0x30] sm:$0xff] %vm1396_vm11, %v2343_v60 }
 0x742 LB: > { %v4179_v61 = vpack.c.bf16 %v4887_v58, %v4882_v57  ;;  %v4404_v62 = vmov 0.0|0.0   ;;  %vm4405_vm13 = vmmov 0   ;;  %v4406_v63 = vmov 0.0   ;;  %v2480_v37 = vld [vmem:[#allocation8] sm:$0xff]  ;;  %v2405_v38 = vld [vmem:[#allocation7] sm:$0xff]  ;;  %v2524_v39 = vld [vmem:[#allocation9] sm:$0xff]  ;;  %s4391_s5 = sphi %s4928_s5, %s2400_s5  }
 0x743   : > { %4178 = vmatprep.subr.bf16.mxu0 %v4404_v62  ;;  %4033 = vmatprep.mubr.msk.f32.mxu0 %vm4405_vm13, %v4406_v63  ;;  %v4182_v36 = vpack.c.bf16 %v4900_v1, %v4892_v59  ;;  %s4407_s6 = smov 16   ;;  %v2599_v40 = vld [vmem:[#allocation10] sm:$0xff]  ;;  %s2401_s8 = ssub.s32 7, %s4391_s5 }
 0x744   : > { %4180 = vmatpush3.bf16.msra.mxu0 %v4179_v61  ;;  %4181 = vmatprep.subr.bf16.mxu1 %v4404_v62  ;;  %s3545_s23 = sshll.u32 %s4391_s5, 3  ;;  %s4943_s24 = sshll.u32 %s2401_s8, 3 }
 0x745   : > { %4183 = vmatpush3.bf16.msra.mxu1 %v4182_v36  ;;  %4040 = vmatprep.mubr.msk.f32.mxu1 %vm4405_vm13, %v4406_v63  ;;  %s2403_s25 = scalar_lea.vmem [#allocation3], %s3545_s23  ;;  %s2522_s4 = scalar_lea.vmem [#allocation4], %s4943_s24 }
 0x746   : > { %2489 = vrot.lane.b32.xlu1 %v2480_v37, %s4407_s6  ;;  %s4408_s26 = smov 96   ;;  %s4409_s13 = smov 32  }
 0x747   : > { %4034 = vmatmul.mubr.msk.f32.vlgmr.msra.gmra.mrb[0].mxu0 %vm1538_vm10, %v2405_v38  ;;  %s4410_s1 = smov 112   ;;  %s4411_s27 = smov 80  }
 0x748   : > { %4041 = vmatmul.mubr.msk.f32.vlgmr.msra.gmra.mrb[0].mxu1 %vm1538_vm10, %v2524_v39  ;;  %v2404_v41 = vld [vmem:[%s2403_s25] sm:$0xff]  ;;  %s2519_s28 = scalar_lea.vmem [#allocation5], %s3545_s23  ;;  %s2638_s29 = scalar_lea.vmem [#allocation6], %s4943_s24 }
 0x749   : > { %v2523_v42 = vld [vmem:[%s2522_s4] sm:$0xff]  ;;  %s2400_s5 = sadd.s32 1, %s4391_s5  }
 0x74a   : > { %2608 = vrot.lane.b32.xlu1 %v2599_v40, %s4407_s6  ;;  %p2397_p1 = scmp.ge.s32.totalorder %s2400_s5, 8  }
 0x74b   :  { %v2658_v29 = vld [vmem:[%s5148_s9 + $0x10] sm:$0xff] (%p2397_p1)  ;;  %v2659_v30 = vld [vmem:[%s5148_s9 + $0x18] sm:$0xff] (%p2397_p1)  ;;  %4356 = vset.pattern.permute.xlu1 (%p2397_p1), %v4393_v0  ;;  %4355 = vset.pattern.permute.xlu0 (%p2397_p1), %v4393_v0  ;;  %v2656_v57 = vld [vmem:[%s5148_s9] sm:$0xff] (%p2397_p1)  ;;  %vm2918_vm14 = vcmask (%p2397_p1), 7168   ;;  %vm4413_vm15 = vmmov (%p2397_p1), 0  }
 0x74c   :  { %v4184_v32 = vpack.c.bf16 (%p2397_p1), %v2659_v30, %v2658_v29  ;;  %v2657_v58 = vld [vmem:[%s5148_s9 + $0x8] sm:$0xff] (%p2397_p1) }
 0x74d   :  { %v4188_v59 = vpack.c.bf16 (%p2397_p1), %v2657_v58, %v2656_v57 }
 0x74e   :  { %4185 = vmatprep.subr.bf16.mxu0 (%p2397_p1), %v4184_v32  ;;  %4274 = vmatprep.subr.bf16.mxu1 (%p2397_p1), %v4184_v32 }
 0x74f   :  { %4187 = vmatpush3.bf16.msra.mxu0 (%p2397_p1), %v4184_v32  ;;  %4275 = vmatpush3.bf16.msra.mxu1 (%p2397_p1), %v4184_v32 }
 0x750   :  { %4189 = vmatprep.subr.bf16.mxu0 (%p2397_p1), %v4188_v59 }
 0x7b8   : > { %v2490_v11 = vpop.permute.xlu1 %2489 }
 0x7bc   : > { %v2609_v13 = vpop.permute.xlu1 %2608 }
 0x81a   : > { %v2475_v43 = vpop.f32.mrb[0].mxu0 }
 0x81b   : > { %v2479_v44 = vadd.f32 %v2475_v43, %v2404_v41  ;;  %v4035_v46 = vpop.f32.mrb[1].mxu0  ;;  %v2594_v47 = vpop.f32.mrb[0].mxu1 }
 0x81c   : > { %v2598_v48 = vadd.f32 %v2594_v47, %v2523_v42  ;;  %v4042_v49 = vpop.f32.mrb[1].mxu1 }
 0x81d   : > { %4339 = vtanh.f32 %v2479_v44  ;;  %v2481_v52 = vsub.f32 0.0, %v2479_v44 }
 0x81e   : > { %4341 = vtanh.f32 %v2598_v48  ;;  %v2600_v54 = vsub.f32 0.0, %v2598_v48 }
 0x81f   : > { %v2482_v53 = vmul.f32 1.442695, %v2481_v52 }
 0x820   : > { %v2601_v55 = vmul.f32 1.442695, %v2600_v54 }
 0x821   : > { %4343 = vpow2.f32 %v2482_v53 }
 0x822   : > { %4345 = vpow2.f32 %v2601_v55 }
 0x827   : > { %v4340_v50 = vpop.eup %4339 }
 0x828   : > { %2494 = vrot.lane.b32.xlu0 %v4340_v50, %s4408_s26  ;;  %v4342_v51 = vpop.eup %4341 }
 0x82b   : > { %v4344_v56 = vpop.eup %4343 }
 0x82c   : > { %2613 = vrot.lane.b32.xlu0 %v4342_v51, %s4408_s26  ;;  %v2484_v2 = vadd.f32 1.0, %v4344_v56  ;;  %v4346_v3 = vpop.eup %4345 }
 0x82d   : > { %v2603_v4 = vadd.f32 1.0, %v4346_v3 }
 0x82e   : > { %4347 = vrcp.f32 %v2484_v2 }
 0x82f   : > { %4349 = vrcp.f32 %v2603_v4 }
 0x838   : > { %v4348_v5 = vpop.eup %4347 }
 0x839   : > { %v4350_v8 = vpop.eup %4349  ;;  %v2492_v12 = vmul.f32 %v4348_v5, %v2490_v11 }
 0x83a   : > { %v2611_v16 = vmul.f32 %v4350_v8, %v2609_v13 }
 0x89a   : > { %v2495_v6 = vpop.permute.xlu0 %2494 }
 0x89b   : > { %v2497_v7 = vmul.f32 %v4348_v5, %v2495_v6 }
 0x89d   : > { %2499 = vrot.lane.b32.xlu0 %v2497_v7, %s4407_s6 }
 0x89e   : > { %v2614_v9 = vpop.permute.xlu0 %2613 }
 0x89f   : > { %v2616_v10 = vmul.f32 %v4350_v8, %v2614_v9 }
 0x8a1   : > { %2618 = vrot.lane.b32.xlu1 %v2616_v10, %s4407_s6 }
 0x90f   : > { %v2500_v14 = vpop.permute.xlu0 %2499 }
 0x910   : > { %v2502_v15 = vadd.f32 %v2500_v14, %v2492_v12 }
 0x912   : > { %4351 = vtanh.f32 %v2502_v15 }
 0x913   : > { %v2619_v17 = vpop.permute.xlu1 %2618 }
 0x914   : > { %v2621_v18 = vadd.f32 %v2619_v17, %v2611_v16 }
 0x916   : > { %4353 = vtanh.f32 %v2621_v18 }
 0x91c   : > { %v4352_v19 = vpop.eup %4351 }
 0x91d   : > { %2505 = vrot.lane.b32.xlu0 %v4352_v19, %s4409_s13 }
 0x920   : > { %v4354_v20 = vpop.eup %4353 }
 0x921   : > { %2624 = vrot.lane.b32.xlu1 %v4354_v20, %s4409_s13 }
 0x925   : > { %2515 = vrot.lane.b32.xlu1 %v2502_v15, %s4410_s1 }
 0x929   : > { %2634 = vrot.lane.b32.xlu1 %v2621_v18, %s4410_s1 }
 0x98f   : > { %v2506_v21 = vpop.permute.xlu0 %2505 }
 0x990   : > { %v2508_v22 = vmul.f32 %v4348_v5, %v2506_v21 }
 0x992   : > { %2510 = vrot.lane.b32.xlu0 %v2508_v22, %s4411_s27 }
 0x993   : > { %v2625_v23 = vpop.permute.xlu1 %2624 }
 0x994   : > { %v2627_v24 = vmul.f32 %v4350_v8, %v2625_v23 }
 0x996   : > { %2629 = vrot.lane.b32.xlu0 %v2627_v24, %s4411_s27 }
 0x997   : > { %v2516_v25 = vpop.permute.xlu1 %2515 }
 0x998   : > { %2518 = vst.msk [vmem:[#allocation8] sm:$0xff] %vm1538_vm10, %v2516_v25 }
 0x99b   : > { %v2635_v26 = vpop.permute.xlu1 %2634 }
 0x99c   : > { %2637 = vst.msk [vmem:[#allocation10] sm:$0xff] %vm1538_vm10, %v2635_v26 }
 0xa03   :  { %2399 = sbr.rel (!%p2397_p1) target bundleno = 1858 (0x742), region = 130 }
 0xa04   : > { %v2511_v27 = vpop.permute.xlu0 %2510 }
 0xa05   : > { %2513 = vst.msk [vmem:[#allocation7] sm:$0xff] %vm1538_vm10, %v2511_v27  ;;  %2520 = vst.msk [vmem:[%s2519_s28] sm:$0xff] %vm1538_vm10, %v2511_v27 }
 0xa08   : > { %v2630_v28 = vpop.permute.xlu0 %2629 }
 0xa09   : > { %2632 = vst.msk [vmem:[#allocation9] sm:$0xff] %vm1538_vm10, %v2630_v28  ;;  %2639 = vst.msk [vmem:[%s2638_s29] sm:$0xff] %vm1538_vm10, %v2630_v28 }
 0xa0c   :  { %v5006_v62 = vld [vmem:[#allocation5] sm:$0xff]  ;;  %v5012_v63 = vld [vmem:[#allocation5 + $0x8] sm:$0xff]  ;;  %v5014_v36 = vld [vmem:[#allocation5 + $0x10] sm:$0xff] }
 0xa0d   :  { %v5020_v37 = vld [vmem:[#allocation5 + $0x18] sm:$0xff]  ;;  %v5022_v38 = vld [vmem:[#allocation5 + $0x20] sm:$0xff]  ;;  %v5028_v39 = vld [vmem:[#allocation5 + $0x28] sm:$0xff] }
 0xa0e   :  { %v5030_v40 = vld [vmem:[#allocation5 + $0x30] sm:$0xff]  ;;  %v5036_v41 = vld [vmem:[#allocation5 + $0x38] sm:$0xff] }
 0xa10   :  { %v4968_v31 = vld [vmem:[#allocation6] sm:$0xff]  ;;  %v4980_v1 = vld [vmem:[#allocation6 + $0x8] sm:$0xff]  ;;  %v4982_v0 = vld [vmem:[#allocation6 + $0x10] sm:$0xff] }
 0xa11   :  { %4047 = vmatprep.mubr.msk.f32.mxu0 %vm1538_vm10, %v4968_v31  ;;  %v4984_v33 = vld [vmem:[#allocation6 + $0x30] sm:$0xff]  ;;  %v4988_v34 = vld [vmem:[#allocation6 + $0x38] sm:$0xff]  ;;  %v4998_v60 = vld [vmem:[#allocation6 + $0x20] sm:$0xff] }
 0xa12   :  { %4056 = vmatprep.mubr.msk.f32.mxu1 %vm1538_vm10, %v4984_v33  ;;  %4048 = vmatmul.mubr.msk.f32.vlgmr.msra.gmra.mrb[0].mxu0 %vm1538_vm10, %v4980_v1  ;;  %v4996_v35 = vld [vmem:[#allocation6 + $0x18] sm:$0xff]  ;;  %v5004_v61 = vld [vmem:[#allocation6 + $0x28] sm:$0xff] }
 0xa13   :  { %4057 = vmatmul.mubr.msk.f32.vlgmr.msra.gmra.mrb[0].mxu1 %vm1538_vm10, %v4988_v34  ;;  %4191 = vmatpush3.bf16.msra.mxu0 %v4188_v59 }
 0xa14   :  { %4050 = vmatprep.mubr.msk.f32.mxu0 %vm1538_vm10, %v4982_v0  ;;  %4079 = vmatprep.mubr.msk.f32.mxu1 %vm4413_vm15, %v4395_v45 }
 0xa16   :  { %4051 = vmatmul.mubr.msk.f32.gmra.mrb[2].mxu0 %vm1538_vm10, %v4996_v35 }
 0xa17   :  { %4053 = vmatprep.mubr.msk.f32.mxu0 %vm1538_vm10, %v4998_v60 }
 0xa1a   :  { %4054 = vmatmul.mubr.msk.f32.gmra.mrb[4].mxu0 %vm1538_vm10, %v5004_v61 }
 0xa1b   :  { %4063 = vmatprep.mubr.msk.f32.mxu0 %vm1538_vm10, %v5006_v62 }
 0xa1e   :  { %4064 = vmatmul.mubr.msk.f32.vlgmr.msra.gmra.mrb[0].mxu0 %vm1538_vm10, %v5012_v63 }
 0xa1f   :  { %4066 = vmatprep.mubr.msk.f32.mxu0 %vm1538_vm10, %v5014_v36 }
 0xa22   :  { %4067 = vmatmul.mubr.msk.f32.gmra.mrb[2].mxu0 %vm1538_vm10, %v5020_v37 }
 0xa23   :  { %4069 = vmatprep.mubr.msk.f32.mxu0 %vm1538_vm10, %v5022_v38 }
 0xa26   :  { %4070 = vmatmul.mubr.msk.f32.gmra.mrb[4].mxu0 %vm1538_vm10, %v5028_v39 }
 0xa27   :  { %4072 = vmatprep.mubr.msk.f32.mxu0 %vm1538_vm10, %v5030_v40 }
 0xa2a   :  { %4073 = vmatmul.mubr.msk.f32.gmra.mrb[6].mxu0 %vm1538_vm10, %v5036_v41 }
 0xae6   :  { %v4058_v42 = vpop.f32.mrb[0].mxu1 }
 0xae7   :  { %v2780_v43 = vpop.f32.mrb[1].mxu1 }
 0xaf1   :  { %v4065_v44 = vpop.f32.mrb[0].mxu0 }
 0xaf2   :  { %v2879_v46 = vpop.f32.mrb[1].mxu0  ;;  %v2920_v50 = vsel %vm2918_vm14, %v4065_v44, -inf }
 0xaf3   :  { %v2919_v53 = vsel %vm2918_vm14, %v2879_v46, -inf }
 0xaf5   :  { %v4068_v47 = vpop.f32.mrb[2].mxu0 }
 0xaf6   :  { %v2889_v48 = vpop.f32.mrb[3].mxu0  ;;  %v2922_v7 = vsel %vm2918_vm14, %v4068_v47, -inf }
 0xaf7   :  { %v2921_v9 = vsel %vm2918_vm14, %v2889_v48, -inf }
 0xaf9   :  { %v4071_v49 = vpop.f32.mrb[4].mxu0 }
 0xafa   :  { %v2925_v51 = vsel %vm2918_vm14, %v4071_v49, -inf  ;;  %v2899_v52 = vpop.f32.mrb[5].mxu0 }
 0xafb   :  { %v2926_v54 = vmax.f32 %v2920_v50, %v2925_v51  ;;  %v2923_v55 = vsel %vm2918_vm14, %v2899_v52, -inf }
 0xafc   :  { %v2924_v56 = vmax.f32 %v2919_v53, %v2923_v55 }
 0xafd   :  { %v4074_v2 = vpop.f32.mrb[6].mxu0 }
 0xafe   :  { %v2931_v3 = vmax.f32 %v2924_v56, %v2926_v54  ;;  %v2915_v4 = vadd.f32 %v4074_v2, %v4058_v42  ;;  %v2909_v5 = vpop.f32.mrb[7].mxu0 }
 0xaff   :  { %v2910_v6 = vadd.f32 %v2909_v5, %v2780_v43 }
 0xb00   :  { %v2929_v8 = vsel %vm2918_vm14, %v2915_v4, -inf }
 0xb01   :  { %v2930_v10 = vmax.f32 %v2922_v7, %v2929_v8  ;;  %v2927_v11 = vsel %vm2918_vm14, %v2910_v6, -inf }
 0xb02   :  { %v2928_v12 = vmax.f32 %v2921_v9, %v2927_v11 }
 0xb04   :  { %v2932_v13 = vmax.f32 %v2928_v12, %v2930_v10 }
 0xb06   :  { %v2933_v14 = vmax.f32 %v2931_v3, %v2932_v13 }
 0xb08   :  { %v2938_v15 = vsub.f32 %v2899_v52, %v2933_v14  ;;  %v2939_v16 = vsub.f32 %v4071_v49, %v2933_v14  ;;  %v2940_v17 = vsub.f32 %v2910_v6, %v2933_v14  ;;  %v2941_v18 = vsub.f32 %v2915_v4, %v2933_v14 }
 0xb09   :  { %v2934_v19 = vsub.f32 %v2879_v46, %v2933_v14  ;;  %v2935_v20 = vsub.f32 %v4065_v44, %v2933_v14  ;;  %v2936_v21 = vsub.f32 %v2889_v48, %v2933_v14  ;;  %v2937_v22 = vsub.f32 %v4068_v47, %v2933_v14 }
 0xb0a   :  { %v2950_v27 = vmul.f32 1.442695, %v2938_v15  ;;  %v2952_v28 = vmul.f32 1.442695, %v2939_v16  ;;  %v2954_v29 = vmul.f32 1.442695, %v2940_v17 }
 0xb0b   :  { %v2942_v23 = vmul.f32 1.442695, %v2934_v19  ;;  %v2944_v24 = vmul.f32 1.442695, %v2935_v20  ;;  %v2946_v25 = vmul.f32 1.442695, %v2936_v21 }
 0xb0c   :  { %v2948_v26 = vmul.f32 1.442695, %v2937_v22  ;;  %v2956_v30 = vmul.f32 1.442695, %v2941_v18  ;;  %v3070_v16 = vld [vmem:[%s5149_s10 + $0x10] sm:$0xff]  ;;  %v3071_v17 = vld [vmem:[%s5149_s10 + $0x18] sm:$0xff] }
 0xb0d   :  { %4357 = vpow2.f32 %v2942_v23  ;;  %v4193_v18 = vpack.c.bf16 %v3071_v17, %v3070_v16  ;;  %v4412_v19 = vmov 0.0|0.0   ;;  %v3258_v17 = vld [vmem:[%s5151_s12 + $0x10] sm:$0xff] }
 0xb0e   :  { %4359 = vpow2.f32 %v2944_v24  ;;  %4192 = vmatprep.subr.bf16.mxu1 %v4412_v19 }
 0xb0f   :  { %4361 = vpow2.f32 %v2946_v25  ;;  %4194 = vmatpush3.bf16.msra.mxu1 %v4193_v18 }
 0xb10   :  { %4363 = vpow2.f32 %v2948_v26  ;;  %4195 = vmatprep.subr.bf16.mxu1 %v4412_v19 }
 0xb11   :  { %4365 = vpow2.f32 %v2950_v27 }
 0xb12   :  { %4367 = vpow2.f32 %v2952_v28 }
 0xb13   :  { %4369 = vpow2.f32 %v2954_v29 }
 0xb14   :  { %4371 = vpow2.f32 %v2956_v30 }
 0xb17   :  { %v4358_v32 = vpop.eup %4357 }
 0xb18   :  { %v4360_v57 = vpop.eup %4359  ;;  %v2958_v58 = vsel %vm2918_vm14, %v4358_v32, 0.0 }
 0xb19   :  { %v4362_v59 = vpop.eup %4361  ;;  %v2959_v42 = vsel %vm2918_vm14, %v4360_v57, 0.0 }
 0xb1a   :  { %v4364_v43 = vpop.eup %4363  ;;  %v2960_v44 = vadd.f32 %v2959_v42, %v2958_v58  ;;  %v2961_v46 = vsel %vm2918_vm14, %v4362_v59, 0.0 }
 0xb1b   :  { %v4366_v47 = vpop.eup %4365  ;;  %v2963_v49 = vsel %vm2918_vm14, %v4364_v43, 0.0 }
 0xb1c   :  { %v2962_v48 = vadd.f32 %v2961_v46, %v2960_v44  ;;  %v4368_v50 = vpop.eup %4367  ;;  %v2965_v52 = vsel %vm2918_vm14, %v4366_v47, 0.0 }
 0xb1d   :  { %v4370_v53 = vpop.eup %4369  ;;  %v2967_v55 = vsel %vm2918_vm14, %v4368_v50, 0.0 }
 0xb1e   :  { %v2964_v51 = vadd.f32 %v2963_v49, %v2962_v48  ;;  %v4372_v56 = vpop.eup %4371  ;;  %v2969_v3 = vsel %vm2918_vm14, %v4370_v53, 0.0 }
 0xb1f   :  { %v2971_v5 = vsel %vm2918_vm14, %v4372_v56, 0.0 }
 0xb20   :  { %v2966_v54 = vadd.f32 %v2965_v52, %v2964_v51 }
 0xb22   :  { %v2968_v2 = vadd.f32 %v2967_v55, %v2966_v54 }
 0xb24   :  { %v2970_v4 = vadd.f32 %v2969_v3, %v2968_v2 }
 0xb26   :  { %v2972_v6 = vadd.f32 %v2971_v5, %v2970_v4 }
 0xb28   :  { %4373 = vrcp.f32 %v2972_v6  ;;  %v3068_v6 = vld [vmem:[%s5149_s10] sm:$0xff] }
 0xb32   :  { %v4374_v7 = vpop.eup %4373 }
 0xb33   :  { %v2976_v8 = vmul.f32 %v4374_v7, %v4362_v59  ;;  %v2974_v9 = vmul.f32 %v4374_v7, %v4358_v32  ;;  %v2977_v10 = vmul.f32 %v4374_v7, %v4364_v43  ;;  %v2975_v11 = vmul.f32 %v4374_v7, %v4360_v57 }
 0xb34   :  { %v2979_v12 = vmul.f32 %v4374_v7, %v4368_v50  ;;  %v2978_v13 = vmul.f32 %v4374_v7, %v4366_v47  ;;  %v2981_v14 = vmul.f32 %v4374_v7, %v4372_v56  ;;  %v2980_v15 = vmul.f32 %v4374_v7, %v4370_v53 }
 0xb35   :  { %2994 = vperm.xlu1 %4356, %v2976_v8   ;;  %2984 = vperm.xlu0 %4355, %v2974_v9  }
 0xb39   :  { %2999 = vperm.xlu1 %4356, %v2977_v10   ;;  %2989 = vperm.xlu0 %4355, %v2975_v11  }
 0xb3d   :  { %3009 = vperm.xlu1 %4356, %v2979_v12   ;;  %3004 = vperm.xlu0 %4355, %v2978_v13  }
 0xb41   :  { %3019 = vperm.xlu1 %4356, %v2981_v14   ;;  %3014 = vperm.xlu0 %4355, %v2980_v15   ;;  %v3257_v15 = vld [vmem:[%s5151_s12 + $0x8] sm:$0xff] }
 0xbb4   :  { %v2995_v20 = vpop.permute.xlu1 %2994  ;;  %v2985_v21 = vpop.permute.xlu0 %2984 }
 0xbb5   :  { %v3022_v22 = vmul.f32 %v2985_v21, %v5006_v62  ;;  %v3045_v23 = vmul.f32 %v2985_v21, %v4968_v31  ;;  %v3024_v26 = vmul.f32 %v2995_v20, %v5014_v36  ;;  %v3047_v27 = vmul.f32 %v2995_v20, %v4982_v0  ;;  %v3260_v20 = vld [vmem:[%s5151_s12 + $0x20] sm:$0xff]  ;;  %v3261_v21 = vld [vmem:[%s5151_s12 + $0x28] sm:$0xff] }
 0xbb7   :  { %v3030_v30 = vsel %vm1538_vm10, %v3022_v22, 0.0  ;;  %v3053_v32 = vsel %vm1538_vm10, %v3045_v23, 0.0  ;;  %v4205_v22 = vpack.c.bf16 %v3261_v21, %v3260_v20  ;;  %v3262_v23 = vld [vmem:[%s5151_s12 + $0x30] sm:$0xff] }
 0xbb8   :  { %v3000_v24 = vpop.permute.xlu1 %2999  ;;  %v2990_v25 = vpop.permute.xlu0 %2989 }
 0xbb9   :  { %v3023_v28 = vmul.f32 %v2990_v25, %v5012_v63  ;;  %v3046_v29 = vmul.f32 %v2990_v25, %v4980_v1  ;;  %v3025_v57 = vmul.f32 %v3000_v24, %v5020_v37  ;;  %v3048_v62 = vmul.f32 %v3000_v24, %v4996_v35  ;;  %v3263_v24 = vld [vmem:[%s5151_s12 + $0x38] sm:$0xff] }
 0xbba   :  { %v3033_v63 = vsel %vm1538_vm10, %v3024_v26, 0.0  ;;  %v3056_v1 = vsel %vm1538_vm10, %v3047_v27, 0.0  ;;  %v4208_v25 = vpack.c.bf16 %v3263_v24, %v3262_v23 }
 0xbbb   :  { %v3031_v31 = vsel %vm1538_vm10, %v3023_v28, 0.0  ;;  %v3054_v58 = vsel %vm1538_vm10, %v3046_v29, 0.0  ;;  %v3035_v35 = vsel %vm1538_vm10, %v3025_v57, 0.0  ;;  %v3058_v47 = vsel %vm1538_vm10, %v3048_v62, 0.0  ;;  %v3567_v29 = vld [vmem:[%s5150_s11] ss:$0 sm:$0xff] }
 0xbbc   :  { %v3032_v59 = vadd.f32 %v3031_v31, %v3030_v30  ;;  %v3055_v36 = vadd.f32 %v3054_v58, %v3053_v32  ;;  %v3010_v42 = vpop.permute.xlu1 %3009  ;;  %v3005_v0 = vpop.permute.xlu0 %3004 }
 0xbbd   :  { %v3026_v43 = vmul.f32 %v3005_v0, %v5022_v38  ;;  %v3049_v44 = vmul.f32 %v3005_v0, %v4998_v60  ;;  %v3027_v48 = vmul.f32 %v3010_v42, %v5028_v39  ;;  %v3050_v49 = vmul.f32 %v3010_v42, %v5004_v61 }
 0xbbe   :  { %v3034_v46 = vadd.f32 %v3033_v63, %v3032_v59  ;;  %v3057_v37 = vadd.f32 %v3056_v1, %v3055_v36 }
 0xbbf   :  { %v3037_v54 = vsel %vm1538_vm10, %v3026_v43, 0.0  ;;  %v3060_v38 = vsel %vm1538_vm10, %v3049_v44, 0.0  ;;  %v3039_v2 = vsel %vm1538_vm10, %v3027_v48, 0.0  ;;  %v3062_v3 = vsel %vm1538_vm10, %v3050_v49, 0.0 }
 0xbc0   :  { %v3036_v50 = vadd.f32 %v3035_v35, %v3034_v46  ;;  %v3059_v51 = vadd.f32 %v3058_v47, %v3057_v37  ;;  %v3020_v52 = vpop.permute.xlu1 %3019  ;;  %v3015_v53 = vpop.permute.xlu0 %3014 }
 0xbc1   :  { %v3051_v60 = vmul.f32 %v3015_v53, %v4984_v33  ;;  %v3052_v39 = vmul.f32 %v3020_v52, %v4988_v34  ;;  %v3028_v61 = vmul.f32 %v3015_v53, %v5030_v40  ;;  %v3069_v33 = vld [vmem:[%s5149_s10 + $0x8] sm:$0xff]  ;;  %v3029_v9 = vmul.f32 %v3020_v52, %v5036_v41  ;;  %v3256_v41 = vld [vmem:[%s5151_s12] sm:$0xff] }
 0xbc2   :  { %v3038_v55 = vadd.f32 %v3037_v54, %v3036_v50  ;;  %v3061_v56 = vadd.f32 %v3060_v38, %v3059_v51  ;;  %v4196_v40 = vpack.c.bf16 %v3069_v33, %v3068_v6  ;;  %v4199_v16 = vpack.c.bf16 %v3257_v15, %v3256_v41 }
 0xbc3   :  { %v3064_v7 = vsel %vm1538_vm10, %v3051_v60, 0.0  ;;  %v3066_v10 = vsel %vm1538_vm10, %v3052_v39, 0.0  ;;  %v3041_v34 = vsel %vm1538_vm10, %v3028_v61, 0.0  ;;  %v3043_v13 = vsel %vm1538_vm10, %v3029_v9, 0.0  ;;  %v3569_v39 = vld [vmem:[#allocation11] ss:$0 sm:$0xff] }
 0xbc4   :  { %v3040_v4 = vadd.f32 %v3039_v2, %v3038_v55  ;;  %v3063_v5 = vadd.f32 %v3062_v3, %v3061_v56 }
 0xbc6   :  { %v3065_v8 = vadd.f32 %v3064_v7, %v3063_v5  ;;  %v3042_v11 = vadd.f32 %v3041_v34, %v3040_v4 }
 0xbc8   :  { %v3067_v12 = vadd.f32 %v3066_v10, %v3065_v8  ;;  %v3044_v14 = vadd.f32 %v3043_v13, %v3042_v11 }
 0xbca   :  { %4080 = vmatmul.mubr.msk.f32.vlgmr.msra.gmra.mrb[2].mxu1 %vm1538_vm10, %v3067_v12 }
 0xbcb   :  { %4197 = vmatpush3.bf16.msra.mxu1 %v4196_v40  ;;  %4086 = vmatprep.mubr.msk.f32.mxu1 %vm4413_vm15, %v4395_v45 }
 0xbcc   :  { %4198 = vmatprep.subr.bf16.mxu1 %v4412_v19 }
 0xbce   :  { %4087 = vmatmul.mubr.msk.f32.vlgmr.msra.gmra.mrb[4].mxu1 %vm1538_vm10, %v3044_v14 }
 0xbcf   :  { %4105 = vmatprep.mubr.msk.f32.mxu1 %vm4413_vm15, %v4395_v45  ;;  %4200 = vmatpush3.bf16.msra.mxu1 %v4199_v16  ;;  %v3259_v45 = vld [vmem:[%s5151_s12 + $0x18] sm:$0xff] }
 0xbd0   :  { %4201 = vmatprep.subr.bf16.mxu1 %v4412_v19  ;;  %v4202_v18 = vpack.c.bf16 %v3259_v45, %v3258_v17 }
 0xbd3   :  { %4203 = vmatpush3.bf16.msra.mxu1 %v4202_v18 }
 0xbd4   :  { %4204 = vmatprep.subr.bf16.mxu1 %v4412_v19 }
 0xbd7   :  { %4206 = vmatpush3.bf16.msra.mxu1 %v4205_v22 }
 0xbd8   :  { %4207 = vmatprep.subr.bf16.mxu1 %v4412_v19 }
 0xbdb   :  { %4209 = vmatpush3.bf16.msra.mxu1 %v4208_v25 }
 0xc9d   :  { %v3141_v26 = vpop.f32.mrb[2].mxu1 }
 0xc9e   :  { %v4081_v27 = vpop.f32.mrb[3].mxu1 }
 0xca1   :  { %v3214_v28 = vpop.f32.mrb[4].mxu1 }
 0xca2   :  { %v3215_v30 = vadd.f32 %v3214_v28, %v3141_v26  ;;  %v4088_v32 = vpop.f32.mrb[5].mxu1 }
 0xca4   :  { %v3225_v19 = vadd.f32 %v3567_v29, %v3215_v30 }
 0xca6   :  { %v3227_v57 = vmul.f32 0.70710677, %v3225_v19  ;;  %v3226_v56 = vmul.f32 0.5, %v3225_v19 }
 0xca8   :  { %v3568_v62 = vclamps-f32 %v3227_v57, 4.0 }
 0xcaa   :  { %v3230_v31 = vmul.f32 %v3568_v62, %v3568_v62 }
 0xcac   :  { %v3231_v58 = vmul.f32 -2.7261424e-10, %v3230_v31  ;;  %v3243_v59 = vmul.f32 -1.45660715e-05, %v3230_v31 }
 0xcae   :  { %v3232_v36 = vadd.f32 2.7706815e-08, %v3231_v58  ;;  %v3244_v42 = vadd.f32 -0.00021337405, %v3243_v59 }
 0xcb0   :  { %v3233_v0 = vmul.f32 %v3232_v36, %v3230_v31  ;;  %v3245_v63 = vmul.f32 %v3244_v42, %v3230_v31 }
 0xcb2   :  { %v3234_v1 = vadd.f32 -2.101024e-06, %v3233_v0  ;;  %v3246_v43 = vadd.f32 -0.001682827, %v3245_v63 }
 0xcb4   :  { %v3235_v44 = vmul.f32 %v3234_v1, %v3230_v31  ;;  %v3247_v46 = vmul.f32 %v3246_v43, %v3230_v31 }
 0xcb6   :  { %v3236_v37 = vadd.f32 -5.6925062e-05, %v3235_v44  ;;  %v3248_v35 = vadd.f32 -0.0073733293, %v3247_v46 }
 0xcb8   :  { %v3237_v47 = vmul.f32 %v3236_v37, %v3230_v31  ;;  %v3249_v48 = vmul.f32 %v3248_v35, %v3230_v31 }
 0xcba   :  { %v3238_v49 = vadd.f32 -0.00073499064, %v3237_v47  ;;  %v3250_v50 = vadd.f32 -0.014264739, %v3249_v48 }
 0xcbc   :  { %v3239_v51 = vmul.f32 %v3238_v49, %v3230_v31  ;;  %4375 = vrcp.f32 %v3250_v50 }
 0xcbe   :  { %v3240_v52 = vadd.f32 -0.0029546, %v3239_v51 }
 0xcc0   :  { %v3241_v53 = vmul.f32 %v3240_v52, %v3230_v31 }
 0xcc2   :  { %v3242_v54 = vadd.f32 -0.016096033, %v3241_v53 }
 0xcc4   :  { %v3251_v38 = vmul.f32 %v3568_v62, %v3242_v54 }
 0xcc6   :  { %v4376_v60 = vpop.eup %4375 }
 0xcc7   :  { %v3253_v55 = vmul.f32 %v4376_v60, %v3251_v38 }
 0xcc9   :  { %v3254_v2 = vadd.f32 1.0, %v3253_v55 }
 0xccb   :  { %v3255_v3 = vmul.f32 %v3254_v2, %v3226_v56 }
 0xccd   :  { %4106 = vmatmul.mubr.msk.f32.vlgmr.msra.gmra.mrb[6].mxu1 %vm1396_vm11, %v3255_v3 }
 0xda0   :  { %v3340_v61 = vpop.f32.mrb[6].mxu1 }
 0xda1   :  { %v3341_v4 = vadd.f32 %v3569_v39, %v3340_v61  ;;  %v4107_v5 = vpop.f32.mrb[7].mxu1 }
 0xda3   :  { %3344 = vst.msk [vmem:[%s5153_s14] sm:$0xff] %vm2918_vm14, %v3341_v4 }

</bundles_post_ra>
